<compile_context>
chip_gen: v5e
topology: v5e:2x2
jax: 0.10.0
libtpu: 0.0.40
codegen_flags: <defaults>
</compile_context>

<pallas_src>
import functools
import math

import jax
import jax.numpy as jnp
from jax import lax
from jax.experimental import pallas as pl
from jax.experimental.pallas import tpu as pltpu


def _sigmoid(x):
    # sigmoid(x) == 0.5*(tanh(x/2)+1): one EUP push instead of exp + reciprocal.
    return 0.5 * (jnp.tanh(0.5 * x) + 1.0)


def _lstm_block_kernel(x_ref, wih_ref, whh_ref, b_ref, o_ref, h_sc, c_sc, *,
                       time_block, hidden, num_directions, n_time_blocks,
                       t_valid, needs_mask):
    """One (direction, batch-block, time-block) grid step.

    x_ref  : (TB, Nb, I)  bf16 input block (forward time order)
    wih_ref: (I, 4H)      bf16 input weights, resident per direction
    whh_ref: (H, 4H)      bf16 recurrent weights, resident per direction
    b_ref  : (1, 4H)      f32 bias (b_ih + b_hh)
    o_ref  : (TB, Nb, H)  bf16 hidden-state outputs for this block
    h_sc   : (Nb, H) bf16 / c_sc: (Nb, H) f32 carry, persistent over time axis
    """
    tb = pl.program_id(2)
    H = hidden
    TB = time_block

    @pl.when(tb == 0)
    def _():
        h_sc[...] = jnp.zeros_like(h_sc)
        c_sc[...] = jnp.zeros_like(c_sc)

    nb_batch = x_ref.shape[1]
    w_ih = wih_ref[...]                       # hoisted out of the step loop
    w_hh = whh_ref[...]
    bias = jnp.broadcast_to(b_ref[...].astype(jnp.float32), (nb_batch, 4 * H))

    def run(reverse):
        # statically-unrolled steps with static row offsets; the cross-block
        # time reversal is handled by the index_map, the within-block reversal
        # by the static traversal order.
        for s in range(TB):
            row = TB - 1 - s if reverse else s
            gates = (jnp.dot(x_ref[row], w_ih, preferred_element_type=jnp.float32)
                     + jnp.dot(h_sc[...], w_hh, preferred_element_type=jnp.float32)
                     + bias)                                    # (Nb, 4H) f32
            i_g = _sigmoid(gates[:, 0:H])
            f_g = _sigmoid(gates[:, H:2 * H])
            g_g = jnp.tanh(gates[:, 2 * H:3 * H])
            o_g = _sigmoid(gates[:, 3 * H:4 * H])
            c_new = f_g * c_sc[...] + i_g * g_g
            h_new = (o_g * jnp.tanh(c_new)).astype(h_sc.dtype)
            if reverse and needs_mask:
                # the padded tail of the sequence is processed FIRST by the
                # backward direction; keep the carry at zero through it.
                data_blk = n_time_blocks - 1 - tb
                valid = data_blk * TB + row < t_valid
                c_sc[...] = jnp.where(valid, c_new, c_sc[...])
                h_sc[...] = jnp.where(valid, h_new, h_sc[...])
            else:
                c_sc[...] = c_new
                h_sc[...] = h_new
            o_ref[row] = h_new.astype(o_ref.dtype)

    if num_directions == 1:
        run(reverse=False)
    else:
        d = pl.program_id(0)

        @pl.when(d == 0)
        def _():
            run(reverse=False)

        @pl.when(d == 1)
        def _():
            run(reverse=True)


def _pick_time_block(T, max_block=8):
    """TB time steps per grid iteration (amortizes ~0.35us/step grid overhead)."""
    if T <= max_block:
        return T
    for cand in range(max_block, max_block // 2, -1):   # prefer an exact divisor
        if T % cand == 0:
            return cand
    return max_block                                    # otherwise pad T up


def _lstm_recurrence(x, w_ih_t, w_hh_t, b, hidden_size, time_block, t_real):
    """x: (Tp, N, I) bf16 (already padded).  Returns (D, Tp, N, H) bf16."""
    Tp, N, I = x.shape
    D = w_hh_t.shape[0]
    H = hidden_size
    TB = time_block
    n_tb = Tp // TB
    needs_mask = Tp != t_real

    # batch-block "parallel" axis so v7x's second TensorCore is used when D==1
    NB = 2 if (D == 1 and N % 2 == 0 and (N // 2) % 8 == 0) else 1
    Nb = N // NB

    def tmap(d, tb):
        # forward walks time blocks 0..n_tb-1, backward walks them in reverse
        # — zero-copy time reversal, no x[::-1] materialization.
        return (1 - d) * tb + d * (n_tb - 1 - tb)

    kernel = functools.partial(
        _lstm_block_kernel, time_block=TB, hidden=H, num_directions=D,
        n_time_blocks=n_tb, t_valid=t_real, needs_mask=needs_mask)

    # generation-aware VMEM budget (~15% headroom below physical capacity)
    est = (2 * TB * Nb * I * 2 + 2 * TB * Nb * H * 2      # dbl-buffered x / out blocks
           + (I + H) * 4 * H * 2 + 4 * H * 4              # resident bf16 weights + bias
           + Nb * H * (2 + 4))                            # h (bf16) / c (f32) carry
    try:
        vmem_cap = int(pltpu.get_tpu_info().vmem_capacity_bytes)
    except Exception:
        vmem_cap = 64 * 2 ** 20                           # conservative fallback
    vmem_limit = int(min(max(2 * est, 32 * 2 ** 20), int(0.85 * vmem_cap)))

    cost = pl.CostEstimate(
        flops=int(2 * D * Tp * N * (I + H) * 4 * H + 12 * D * Tp * N * H),
        transcendentals=int(5 * D * Tp * N * H),
        bytes_accessed=int(D * Tp * N * (I + H) * 2
                           + D * (I + H) * 4 * H * 2 + D * 4 * H * 4),
    )

    return pl.pallas_call(
        kernel,
        out_shape=jax.ShapeDtypeStruct((D, Tp, N, H), jnp.bfloat16),
        grid_spec=pltpu.PrefetchScalarGridSpec(
            num_scalar_prefetch=0,
            grid=(D, NB, n_tb),
            in_specs=[
                # streamed bf16 input block for this (direction, batch, time) step
                pl.BlockSpec((TB, Nb, I), lambda d, nb, tb: (tmap(d, tb), nb, 0)),
                # per-direction weights/bias, single-buffered (resident once)
                pl.BlockSpec((None, I, 4 * H), lambda d, nb, tb: (d, 0, 0),
                             pipeline_mode=pl.Buffered(1)),
                pl.BlockSpec((None, H, 4 * H), lambda d, nb, tb: (d, 0, 0),
                             pipeline_mode=pl.Buffered(1)),
                pl.BlockSpec((None, 1, 4 * H), lambda d, nb, tb: (d, 0, 0),
                             pipeline_mode=pl.Buffered(1)),
            ],
            out_specs=pl.BlockSpec((None, TB, Nb, H),
                                   lambda d, nb, tb: (d, tmap(d, tb), nb, 0)),
            scratch_shapes=[
                pltpu.VMEM((Nb, H), jnp.bfloat16),   # h carry (already matmul lhs dtype)
                pltpu.VMEM((Nb, H), jnp.float32),    # c carry
            ],
        ),
        compiler_params=pltpu.CompilerParams(
            dimension_semantics=("parallel", "parallel", "arbitrary"),
            vmem_limit_bytes=vmem_limit,
        ),
        cost_estimate=cost,
    )(x, w_ih_t, w_hh_t, b)


def rnn_forward(x, params, bidirectional=False):
    """Equivalent of RNN.forward with rnn_type=nn.LSTM.

    x: (T, N, input_size).  params: stacked per-direction tensors:
        'w_ih_t': (D, I, 4H) bf16, 'w_hh_t': (D, H, 4H) bf16, 'b': (D, 1, 4H) f32.
    Returns (T, N, H) f32; bidirectional outputs are summed, matching
    view(T, N, 2, H).sum(dim=2).
    """
    w_ih_t, w_hh_t, b = params["w_ih_t"], params["w_hh_t"], params["b"]
    D = 2 if bidirectional else 1
    assert w_ih_t.shape[0] == D
    H = w_hh_t.shape[1]
    T, N, I = x.shape

    # bf16 MXU operands; f32 accumulation is kept via preferred_element_type.
    x = x.astype(jnp.bfloat16)

    TB = _pick_time_block(T)
    Tp = -(-T // TB) * TB
    if Tp != T:   # pad awkward/prime T instead of collapsing TB to 1
        x = jnp.concatenate([x, jnp.zeros((Tp - T, N, I), x.dtype)], axis=0)

    out = _lstm_recurrence(x, w_ih_t, w_hh_t, b, H, TB, T)[:, :T]
    if not bidirectional:
        return out[0].astype(jnp.float32)
    return out[0].astype(jnp.float32) + out[1].astype(jnp.float32)


# ---------------------------------------------------------------------------
# pure-JAX reference (for verification only)
# ---------------------------------------------------------------------------
def _lstm_ref_single(x, w_ih, w_hh, b):
    # w_ih: (4H, I), w_hh: (4H, H), b: (4H,), x: (T, N, I) f32
    H = w_hh.shape[1]
    N = x.shape[1]

    def step(carry, x_t):
        h, c = carry
        gates = x_t @ w_ih.T + h @ w_hh.T + b
        i = jax.nn.sigmoid(gates[:, 0:H])
        f = jax.nn.sigmoid(gates[:, H:2 * H])
        g = jnp.tanh(gates[:, 2 * H:3 * H])
        o = jax.nn.sigmoid(gates[:, 3 * H:4 * H])
        c = f * c + i * g
        h = o * jnp.tanh(c)
        return (h, c), h

    init = (jnp.zeros((N, H), jnp.float32), jnp.zeros((N, H), jnp.float32))
    _, ys = lax.scan(step, init, x)
    return ys


def _rnn_ref(x, ref_weights, bidirectional=False):
    w_ih, w_hh, b = ref_weights
    out = _lstm_ref_single(x, w_ih[0], w_hh[0], b[0])
    if bidirectional:
        out = out + _lstm_ref_single(x[::-1], w_ih[1], w_hh[1], b[1])[::-1]
    return out


# ---------------------------------------------------------------------------
# deterministic parameter construction (PyTorch-style uniform(-1/sqrt(H), 1/sqrt(H)))
# ---------------------------------------------------------------------------
def make_params(key, input_size, hidden_size, bidirectional):
    D = 2 if bidirectional else 1
    H, I = hidden_size, input_size
    scale = 1.0 / math.sqrt(H)
    keys = jax.random.split(key, 4 * D)
    w_ih = jnp.stack([jax.random.uniform(keys[4 * d + 0], (4 * H, I),
                                         jnp.float32, -scale, scale) for d in range(D)])
    w_hh = jnp.stack([jax.random.uniform(keys[4 * d + 1], (4 * H, H),
                                         jnp.float32, -scale, scale) for d in range(D)])
    b_ih = jnp.stack([jax.random.uniform(keys[4 * d + 2], (4 * H,),
                                         jnp.float32, -scale, scale) for d in range(D)])
    b_hh = jnp.stack([jax.random.uniform(keys[4 * d + 3], (4 * H,),
                                         jnp.float32, -scale, scale) for d in range(D)])
    params = {
        "w_ih_t": jnp.transpose(w_ih, (0, 2, 1)).astype(jnp.bfloat16),  # (D, I, 4H)
        "w_hh_t": jnp.transpose(w_hh, (0, 2, 1)).astype(jnp.bfloat16),  # (D, H, 4H)
        "b": (b_ih + b_hh).reshape(D, 1, 4 * H),                        # (D, 1, 4H) f32
    }
    # reference uses the same bf16-quantized weights (cast back to f32) so the
    # check isolates kernel correctness from the deliberate bf16 quantization.
    ref_w = (jnp.transpose(params["w_ih_t"].astype(jnp.float32), (0, 2, 1)),
             jnp.transpose(params["w_hh_t"].astype(jnp.float32), (0, 2, 1)),
             (b_ih + b_hh))
    return params, ref_w


if __name__ == "__main__":
    key = jax.random.PRNGKey(0)
    ks = jax.random.split(key, 8)

    def check(T, N, I, H, bidirectional, kx, kp):
        params, ref_w = make_params(kp, I, H, bidirectional)
        x = jax.random.normal(kx, (T, N, I), jnp.float32)
        out = jax.block_until_ready(rnn_forward(x, params, bidirectional))
        assert out.shape == (T, N, H)
        x_q = x.astype(jnp.bfloat16).astype(jnp.float32)   # kernel consumes bf16 x
        ref = _rnn_ref(x_q, ref_w, bidirectional)
        err = float(jnp.max(jnp.abs(out - ref)))
        assert jnp.allclose(out, ref, atol=3e-2, rtol=3e-2), (T, N, bidirectional, err)

    check(16, 2, 16, 32, False, ks[0], ks[1])    # multi-time-block carry, single dir
    check(16, 2, 16, 32, True, ks[2], ks[3])     # bidirectional: reversed index_map + sum
    check(11, 2, 16, 32, True, ks[4], ks[5])     # padded T (TB=8 -> Tp=16) + masked reverse
    check(16, 16, 16, 32, False, ks[6], ks[7])   # batch-block parallel axis (NB=2)
    print("KERNEL_OK")
</pallas_src>

<mosaic_0001>
module attributes {stable_mosaic.version = 11 : i64} {
  func.func @_lstm_block_kernel(%arg0: i32, %arg1: i32, %arg2: i32, %arg3: memref<8x2x16xbf16, #tpu.memory_space<vmem>>, %arg4: memref<1x16x128xbf16, #tpu.memory_space<vmem>>, %arg5: memref<1x32x128xbf16, #tpu.memory_space<vmem>>, %arg6: memref<1x1x128xf32, #tpu.memory_space<vmem>>, %arg7: memref<1x8x2x32xbf16, #tpu.memory_space<vmem>>, %arg8: memref<2x32xbf16, #tpu.memory_space<vmem>>, %arg9: memref<2x32xf32, #tpu.memory_space<vmem>>) attributes {dimension_semantics = [#tpu.dimension_semantics<parallel>, #tpu.dimension_semantics<parallel>, #tpu.dimension_semantics<arbitrary>], iteration_bounds = array<i64: 1, 1, 2>, scalar_prefetch = 0 : i64, scratch_operands = 2 : i64, tpu.core_type = #tpu.core_type<tc>, window_params = [{transform_indices = @transform_0, window_bounds = array<i64: 8, 2, 16>}, {pipeline_mode = #tpu.pipeline_mode<synchronous>, transform_indices = @transform_1, window_bounds = array<i64: 1, 16, 128>}, {pipeline_mode = #tpu.pipeline_mode<synchronous>, transform_indices = @transform_2, window_bounds = array<i64: 1, 32, 128>}, {pipeline_mode = #tpu.pipeline_mode<synchronous>, transform_indices = @transform_3, window_bounds = array<i64: 1, 1, 128>}, {transform_indices = @transform_4, window_bounds = array<i64: 1, 8, 2, 32>}]} {
    %c0_i32 = arith.constant 0 : i32
    %0 = arith.cmpi eq, %arg2, %c0_i32 : i32
    %1 = arith.extui %0 : i1 to i32
    %c0_i32_0 = arith.constant 0 : i32
    %2 = arith.cmpi ne, %1, %c0_i32_0 : i32
    scf.if %2 {
      %cst_209 = arith.constant 0.000000e+00 : bf16
      %371 = vector.broadcast %cst_209 : bf16 to vector<2x32xbf16>
      %c0_210 = arith.constant 0 : index
      %c0_211 = arith.constant 0 : index
      %372 = vector.load %arg8[%c0_210, %c0_211] : memref<2x32xbf16, #tpu.memory_space<vmem>>, vector<2x32xbf16>
      tpu.vector_store %arg8[%c0_210, %c0_211], %371 {strides = array<i32>} : memref<2x32xbf16, #tpu.memory_space<vmem>>, vector<2x32xbf16>,
      %cst_212 = arith.constant 0.000000e+00 : f32
      %373 = vector.broadcast %cst_212 : f32 to vector<2x32xf32>
      %c0_213 = arith.constant 0 : index
      %c0_214 = arith.constant 0 : index
      %374 = vector.load %arg9[%c0_213, %c0_214] : memref<2x32xf32, #tpu.memory_space<vmem>>, vector<2x32xf32>
      tpu.vector_store %arg9[%c0_213, %c0_214], %373 {strides = array<i32>} : memref<2x32xf32, #tpu.memory_space<vmem>>, vector<2x32xf32>,
    } else {
    }
    %c0 = arith.constant 0 : index
    %c0_1 = arith.constant 0 : index
    %c0_2 = arith.constant 0 : index
    %3 = vector.load %arg4[%c0, %c0_1, %c0_2] : memref<1x16x128xbf16, #tpu.memory_space<vmem>>, vector<1x16x128xbf16>
    %4 = vector.shape_cast %3 : vector<1x16x128xbf16> to vector<16x128xbf16>
    %c0_3 = arith.constant 0 : index
    %c0_4 = arith.constant 0 : index
    %c0_5 = arith.constant 0 : index
    %5 = vector.load %arg5[%c0_3, %c0_4, %c0_5] : memref<1x32x128xbf16, #tpu.memory_space<vmem>>, vector<1x32x128xbf16>
    %6 = vector.shape_cast %5 : vector<1x32x128xbf16> to vector<32x128xbf16>
    %c0_6 = arith.constant 0 : index
    %c0_7 = arith.constant 0 : index
    %c0_8 = arith.constant 0 : index
    %7 = vector.load %arg6[%c0_6, %c0_7, %c0_8] : memref<1x1x128xf32, #tpu.memory_space<vmem>>, vector<1x1x128xf32>
    %8 = vector.shape_cast %7 : vector<1x1x128xf32> to vector<1x128xf32>
    %9 = vector.shape_cast %8 : vector<1x128xf32> to vector<1x128xf32>
    %10 = vector.broadcast %9 : vector<1x128xf32> to vector<2x128xf32>
    %c0_9 = arith.constant 0 : index
    %c0_10 = arith.constant 0 : index
    %c0_11 = arith.constant 0 : index
    %11 = vector.load %arg3[%c0_9, %c0_10, %c0_11] : memref<8x2x16xbf16, #tpu.memory_space<vmem>>, vector<1x2x16xbf16>
    %12 = vector.shape_cast %11 : vector<1x2x16xbf16> to vector<2x16xbf16>
    %cst = arith.constant dense<0.000000e+00> : vector<2x128xf32>
    %13 = tpu.matmul %12, %4, %cst {dimension_numbers = #tpu.dot_dimension_numbers<[1], [0], [0], [1], [0, 0, 1, 1], [], []>} : vector<2x16xbf16>, vector<16x128xbf16>, vector<2x128xf32> -> vector<2x128xf32>
    %c0_12 = arith.constant 0 : index
    %c0_13 = arith.constant 0 : index
    %14 = vector.load %arg8[%c0_12, %c0_13] : memref<2x32xbf16, #tpu.memory_space<vmem>>, vector<2x32xbf16>
    %cst_14 = arith.constant dense<0.000000e+00> : vector<2x128xf32>
    %15 = tpu.matmul %14, %6, %cst_14 {dimension_numbers = #tpu.dot_dimension_numbers<[1], [0], [0], [1], [0, 0, 1, 1], [], []>} : vector<2x32xbf16>, vector<32x128xbf16>, vector<2x128xf32> -> vector<2x128xf32>
    %16 = arith.addf %13, %15 : vector<2x128xf32>
    %17 = arith.addf %16, %10 : vector<2x128xf32>
    %18 = vector.extract_strided_slice %17 {offsets = [0, 0], sizes = [2, 32], strides = [1, 1]} : vector<2x128xf32> to vector<2x32xf32>
    %cst_15 = arith.constant 5.000000e-01 : f32
    %19 = vector.broadcast %cst_15 : f32 to vector<2x32xf32>
    %20 = arith.mulf %19, %18 : vector<2x32xf32>
    %21 = math.tanh %20 : vector<2x32xf32>
    %cst_16 = arith.constant 1.000000e+00 : f32
    %22 = vector.broadcast %cst_16 : f32 to vector<2x32xf32>
    %23 = arith.addf %21, %22 : vector<2x32xf32>
    %cst_17 = arith.constant 5.000000e-01 : f32
    %24 = vector.broadcast %cst_17 : f32 to vector<2x32xf32>
    %25 = arith.mulf %24, %23 : vector<2x32xf32>
    %26 = vector.extract_strided_slice %17 {offsets = [0, 32], sizes = [2, 32], strides = [1, 1]} : vector<2x128xf32> to vector<2x32xf32>
    %cst_18 = arith.constant 5.000000e-01 : f32
    %27 = vector.broadcast %cst_18 : f32 to vector<2x32xf32>
    %28 = arith.mulf %27, %26 : vector<2x32xf32>
    %29 = math.tanh %28 : vector<2x32xf32>
    %cst_19 = arith.constant 1.000000e+00 : f32
    %30 = vector.broadcast %cst_19 : f32 to vector<2x32xf32>
    %31 = arith.addf %29, %30 : vector<2x32xf32>
    %cst_20 = arith.constant 5.000000e-01 : f32
    %32 = vector.broadcast %cst_20 : f32 to vector<2x32xf32>
    %33 = arith.mulf %32, %31 : vector<2x32xf32>
    %34 = vector.extract_strided_slice %17 {offsets = [0, 64], sizes = [2, 32], strides = [1, 1]} : vector<2x128xf32> to vector<2x32xf32>
    %35 = math.tanh %34 : vector<2x32xf32>
    %36 = vector.extract_strided_slice %17 {offsets = [0, 96], sizes = [2, 32], strides = [1, 1]} : vector<2x128xf32> to vector<2x32xf32>
    %cst_21 = arith.constant 5.000000e-01 : f32
    %37 = vector.broadcast %cst_21 : f32 to vector<2x32xf32>
    %38 = arith.mulf %37, %36 : vector<2x32xf32>
    %39 = math.tanh %38 : vector<2x32xf32>
    %cst_22 = arith.constant 1.000000e+00 : f32
    %40 = vector.broadcast %cst_22 : f32 to vector<2x32xf32>
    %41 = arith.addf %39, %40 : vector<2x32xf32>
    %cst_23 = arith.constant 5.000000e-01 : f32
    %42 = vector.broadcast %cst_23 : f32 to vector<2x32xf32>
    %43 = arith.mulf %42, %41 : vector<2x32xf32>
    %c0_24 = arith.constant 0 : index
    %c0_25 = arith.constant 0 : index
    %44 = vector.load %arg9[%c0_24, %c0_25] : memref<2x32xf32, #tpu.memory_space<vmem>>, vector<2x32xf32>
    %45 = arith.mulf %33, %44 : vector<2x32xf32>
    %46 = arith.mulf %25, %35 : vector<2x32xf32>
    %47 = arith.addf %45, %46 : vector<2x32xf32>
    %48 = math.tanh %47 : vector<2x32xf32>
    %49 = arith.mulf %43, %48 : vector<2x32xf32>
    %50 = arith.truncf %49 : vector<2x32xf32> to vector<2x32xbf16>
    %c0_26 = arith.constant 0 : index
    %c0_27 = arith.constant 0 : index
    %51 = vector.load %arg9[%c0_26, %c0_27] : memref<2x32xf32, #tpu.memory_space<vmem>>, vector<2x32xf32>
    tpu.vector_store %arg9[%c0_26, %c0_27], %47 {strides = array<i32>} : memref<2x32xf32, #tpu.memory_space<vmem>>, vector<2x32xf32>,
    %c0_28 = arith.constant 0 : index
    %c0_29 = arith.constant 0 : index
    %52 = vector.load %arg8[%c0_28, %c0_29] : memref<2x32xbf16, #tpu.memory_space<vmem>>, vector<2x32xbf16>
    tpu.vector_store %arg8[%c0_28, %c0_29], %50 {strides = array<i32>} : memref<2x32xbf16, #tpu.memory_space<vmem>>, vector<2x32xbf16>,
    %c0_30 = arith.constant 0 : index
    %c0_31 = arith.constant 0 : index
    %c0_32 = arith.constant 0 : index
    %c0_33 = arith.constant 0 : index
    %53 = vector.load %arg7[%c0_30, %c0_31, %c0_32, %c0_33] : memref<1x8x2x32xbf16, #tpu.memory_space<vmem>>, vector<1x1x2x32xbf16>
    %54 = vector.shape_cast %53 : vector<1x1x2x32xbf16> to vector<2x32xbf16>
    %55 = vector.shape_cast %50 : vector<2x32xbf16> to vector<1x1x2x32xbf16>
    tpu.vector_store %arg7[%c0_30, %c0_31, %c0_32, %c0_33], %55 {strides = array<i32>} : memref<1x8x2x32xbf16, #tpu.memory_space<vmem>>, vector<1x1x2x32xbf16>,
    %c1 = arith.constant 1 : index
    %c0_34 = arith.constant 0 : index
    %c0_35 = arith.constant 0 : index
    %56 = vector.load %arg3[%c1, %c0_34, %c0_35] : memref<8x2x16xbf16, #tpu.memory_space<vmem>>, vector<1x2x16xbf16>
    %57 = vector.shape_cast %56 : vector<1x2x16xbf16> to vector<2x16xbf16>
    %cst_36 = arith.constant dense<0.000000e+00> : vector<2x128xf32>
    %58 = tpu.matmul %57, %4, %cst_36 {dimension_numbers = #tpu.dot_dimension_numbers<[1], [0], [0], [1], [0, 0, 1, 1], [], []>} : vector<2x16xbf16>, vector<16x128xbf16>, vector<2x128xf32> -> vector<2x128xf32>
    %c0_37 = arith.constant 0 : index
    %c0_38 = arith.constant 0 : index
    %59 = vector.load %arg8[%c0_37, %c0_38] : memref<2x32xbf16, #tpu.memory_space<vmem>>, vector<2x32xbf16>
    %cst_39 = arith.constant dense<0.000000e+00> : vector<2x128xf32>
    %60 = tpu.matmul %59, %6, %cst_39 {dimension_numbers = #tpu.dot_dimension_numbers<[1], [0], [0], [1], [0, 0, 1, 1], [], []>} : vector<2x32xbf16>, vector<32x128xbf16>, vector<2x128xf32> -> vector<2x128xf32>
    %61 = arith.addf %58, %60 : vector<2x128xf32>
    %62 = arith.addf %61, %10 : vector<2x128xf32>
    %63 = vector.extract_strided_slice %62 {offsets = [0, 0], sizes = [2, 32], strides = [1, 1]} : vector<2x128xf32> to vector<2x32xf32>
    %cst_40 = arith.constant 5.000000e-01 : f32
    %64 = vector.broadcast %cst_40 : f32 to vector<2x32xf32>
    %65 = arith.mulf %64, %63 : vector<2x32xf32>
    %66 = math.tanh %65 : vector<2x32xf32>
    %cst_41 = arith.constant 1.000000e+00 : f32
    %67 = vector.broadcast %cst_41 : f32 to vector<2x32xf32>
    %68 = arith.addf %66, %67 : vector<2x32xf32>
    %cst_42 = arith.constant 5.000000e-01 : f32
    %69 = vector.broadcast %cst_42 : f32 to vector<2x32xf32>
    %70 = arith.mulf %69, %68 : vector<2x32xf32>
    %71 = vector.extract_strided_slice %62 {offsets = [0, 32], sizes = [2, 32], strides = [1, 1]} : vector<2x128xf32> to vector<2x32xf32>
    %cst_43 = arith.constant 5.000000e-01 : f32
    %72 = vector.broadcast %cst_43 : f32 to vector<2x32xf32>
    %73 = arith.mulf %72, %71 : vector<2x32xf32>
    %74 = math.tanh %73 : vector<2x32xf32>
    %cst_44 = arith.constant 1.000000e+00 : f32
    %75 = vector.broadcast %cst_44 : f32 to vector<2x32xf32>
    %76 = arith.addf %74, %75 : vector<2x32xf32>
    %cst_45 = arith.constant 5.000000e-01 : f32
    %77 = vector.broadcast %cst_45 : f32 to vector<2x32xf32>
    %78 = arith.mulf %77, %76 : vector<2x32xf32>
    %79 = vector.extract_strided_slice %62 {offsets = [0, 64], sizes = [2, 32], strides = [1, 1]} : vector<2x128xf32> to vector<2x32xf32>
    %80 = math.tanh %79 : vector<2x32xf32>
    %81 = vector.extract_strided_slice %62 {offsets = [0, 96], sizes = [2, 32], strides = [1, 1]} : vector<2x128xf32> to vector<2x32xf32>
    %cst_46 = arith.constant 5.000000e-01 : f32
    %82 = vector.broadcast %cst_46 : f32 to vector<2x32xf32>
    %83 = arith.mulf %82, %81 : vector<2x32xf32>
    %84 = math.tanh %83 : vector<2x32xf32>
    %cst_47 = arith.constant 1.000000e+00 : f32
    %85 = vector.broadcast %cst_47 : f32 to vector<2x32xf32>
    %86 = arith.addf %84, %85 : vector<2x32xf32>
    %cst_48 = arith.constant 5.000000e-01 : f32
    %87 = vector.broadcast %cst_48 : f32 to vector<2x32xf32>
    %88 = arith.mulf %87, %86 : vector<2x32xf32>
    %c0_49 = arith.constant 0 : index
    %c0_50 = arith.constant 0 : index
    %89 = vector.load %arg9[%c0_49, %c0_50] : memref<2x32xf32, #tpu.memory_space<vmem>>, vector<2x32xf32>
    %90 = arith.mulf %78, %89 : vector<2x32xf32>
    %91 = arith.mulf %70, %80 : vector<2x32xf32>
    %92 = arith.addf %90, %91 : vector<2x32xf32>
    %93 = math.tanh %92 : vector<2x32xf32>
    %94 = arith.mulf %88, %93 : vector<2x32xf32>
    %95 = arith.truncf %94 : vector<2x32xf32> to vector<2x32xbf16>
    %c0_51 = arith.constant 0 : index
    %c0_52 = arith.constant 0 : index
    %96 = vector.load %arg9[%c0_51, %c0_52] : memref<2x32xf32, #tpu.memory_space<vmem>>, vector<2x32xf32>
    tpu.vector_store %arg9[%c0_51, %c0_52], %92 {strides = array<i32>} : memref<2x32xf32, #tpu.memory_space<vmem>>, vector<2x32xf32>,
    %c0_53 = arith.constant 0 : index
    %c0_54 = arith.constant 0 : index
    %97 = vector.load %arg8[%c0_53, %c0_54] : memref<2x32xbf16, #tpu.memory_space<vmem>>, vector<2x32xbf16>
    tpu.vector_store %arg8[%c0_53, %c0_54], %95 {strides = array<i32>} : memref<2x32xbf16, #tpu.memory_space<vmem>>, vector<2x32xbf16>,
    %c0_55 = arith.constant 0 : index
    %c1_56 = arith.constant 1 : index
    %c0_57 = arith.constant 0 : index
    %c0_58 = arith.constant 0 : index
    %98 = vector.load %arg7[%c0_55, %c1_56, %c0_57, %c0_58] : memref<1x8x2x32xbf16, #tpu.memory_space<vmem>>, vector<1x1x2x32xbf16>
    %99 = vector.shape_cast %98 : vector<1x1x2x32xbf16> to vector<2x32xbf16>
    %100 = vector.shape_cast %95 : vector<2x32xbf16> to vector<1x1x2x32xbf16>
    tpu.vector_store %arg7[%c0_55, %c1_56, %c0_57, %c0_58], %100 {strides = array<i32>} : memref<1x8x2x32xbf16, #tpu.memory_space<vmem>>, vector<1x1x2x32xbf16>,
    %c2 = arith.constant 2 : index
    %c0_59 = arith.constant 0 : index
    %c0_60 = arith.constant 0 : index
    %101 = vector.load %arg3[%c2, %c0_59, %c0_60] : memref<8x2x16xbf16, #tpu.memory_space<vmem>>, vector<1x2x16xbf16>
    %102 = vector.shape_cast %101 : vector<1x2x16xbf16> to vector<2x16xbf16>
    %cst_61 = arith.constant dense<0.000000e+00> : vector<2x128xf32>
    %103 = tpu.matmul %102, %4, %cst_61 {dimension_numbers = #tpu.dot_dimension_numbers<[1], [0], [0], [1], [0, 0, 1, 1], [], []>} : vector<2x16xbf16>, vector<16x128xbf16>, vector<2x128xf32> -> vector<2x128xf32>
    %c0_62 = arith.constant 0 : index
    %c0_63 = arith.constant 0 : index
    %104 = vector.load %arg8[%c0_62, %c0_63] : memref<2x32xbf16, #tpu.memory_space<vmem>>, vector<2x32xbf16>
    %cst_64 = arith.constant dense<0.000000e+00> : vector<2x128xf32>
    %105 = tpu.matmul %104, %6, %cst_64 {dimension_numbers = #tpu.dot_dimension_numbers<[1], [0], [0], [1], [0, 0, 1, 1], [], []>} : vector<2x32xbf16>, vector<32x128xbf16>, vector<2x128xf32> -> vector<2x128xf32>
    %106 = arith.addf %103, %105 : vector<2x128xf32>
    %107 = arith.addf %106, %10 : vector<2x128xf32>
    %108 = vector.extract_strided_slice %107 {offsets = [0, 0], sizes = [2, 32], strides = [1, 1]} : vector<2x128xf32> to vector<2x32xf32>
    %cst_65 = arith.constant 5.000000e-01 : f32
    %109 = vector.broadcast %cst_65 : f32 to vector<2x32xf32>
    %110 = arith.mulf %109, %108 : vector<2x32xf32>
    %111 = math.tanh %110 : vector<2x32xf32>
    %cst_66 = arith.constant 1.000000e+00 : f32
    %112 = vector.broadcast %cst_66 : f32 to vector<2x32xf32>
    %113 = arith.addf %111, %112 : vector<2x32xf32>
    %cst_67 = arith.constant 5.000000e-01 : f32
    %114 = vector.broadcast %cst_67 : f32 to vector<2x32xf32>
    %115 = arith.mulf %114, %113 : vector<2x32xf32>
    %116 = vector.extract_strided_slice %107 {offsets = [0, 32], sizes = [2, 32], strides = [1, 1]} : vector<2x128xf32> to vector<2x32xf32>
    %cst_68 = arith.constant 5.000000e-01 : f32
    %117 = vector.broadcast %cst_68 : f32 to vector<2x32xf32>
    %118 = arith.mulf %117, %116 : vector<2x32xf32>
    %119 = math.tanh %118 : vector<2x32xf32>
    %cst_69 = arith.constant 1.000000e+00 : f32
    %120 = vector.broadcast %cst_69 : f32 to vector<2x32xf32>
    %121 = arith.addf %119, %120 : vector<2x32xf32>
    %cst_70 = arith.constant 5.000000e-01 : f32
    %122 = vector.broadcast %cst_70 : f32 to vector<2x32xf32>
    %123 = arith.mulf %122, %121 : vector<2x32xf32>
    %124 = vector.extract_strided_slice %107 {offsets = [0, 64], sizes = [2, 32], strides = [1, 1]} : vector<2x128xf32> to vector<2x32xf32>
    %125 = math.tanh %124 : vector<2x32xf32>
    %126 = vector.extract_strided_slice %107 {offsets = [0, 96], sizes = [2, 32], strides = [1, 1]} : vector<2x128xf32> to vector<2x32xf32>
    %cst_71 = arith.constant 5.000000e-01 : f32
    %127 = vector.broadcast %cst_71 : f32 to vector<2x32xf32>
    %128 = arith.mulf %127, %126 : vector<2x32xf32>
    %129 = math.tanh %128 : vector<2x32xf32>
    %cst_72 = arith.constant 1.000000e+00 : f32
    %130 = vector.broadcast %cst_72 : f32 to vector<2x32xf32>
    %131 = arith.addf %129, %130 : vector<2x32xf32>
    %cst_73 = arith.constant 5.000000e-01 : f32
    %132 = vector.broadcast %cst_73 : f32 to vector<2x32xf32>
    %133 = arith.mulf %132, %131 : vector<2x32xf32>
    %c0_74 = arith.constant 0 : index
    %c0_75 = arith.constant 0 : index
    %134 = vector.load %arg9[%c0_74, %c0_75] : memref<2x32xf32, #tpu.memory_space<vmem>>, vector<2x32xf32>
    %135 = arith.mulf %123, %134 : vector<2x32xf32>
    %136 = arith.mulf %115, %125 : vector<2x32xf32>
    %137 = arith.addf %135, %136 : vector<2x32xf32>
    %138 = math.tanh %137 : vector<2x32xf32>
    %139 = arith.mulf %133, %138 : vector<2x32xf32>
    %140 = arith.truncf %139 : vector<2x32xf32> to vector<2x32xbf16>
    %c0_76 = arith.constant 0 : index
    %c0_77 = arith.constant 0 : index
    %141 = vector.load %arg9[%c0_76, %c0_77] : memref<2x32xf32, #tpu.memory_space<vmem>>, vector<2x32xf32>
    tpu.vector_store %arg9[%c0_76, %c0_77], %137 {strides = array<i32>} : memref<2x32xf32, #tpu.memory_space<vmem>>, vector<2x32xf32>,
    %c0_78 = arith.constant 0 : index
    %c0_79 = arith.constant 0 : index
    %142 = vector.load %arg8[%c0_78, %c0_79] : memref<2x32xbf16, #tpu.memory_space<vmem>>, vector<2x32xbf16>
    tpu.vector_store %arg8[%c0_78, %c0_79], %140 {strides = array<i32>} : memref<2x32xbf16, #tpu.memory_space<vmem>>, vector<2x32xbf16>,
    %c0_80 = arith.constant 0 : index
    %c2_81 = arith.constant 2 : index
    %c0_82 = arith.constant 0 : index
    %c0_83 = arith.constant 0 : index
    %143 = vector.load %arg7[%c0_80, %c2_81, %c0_82, %c0_83] : memref<1x8x2x32xbf16, #tpu.memory_space<vmem>>, vector<1x1x2x32xbf16>
    %144 = vector.shape_cast %143 : vector<1x1x2x32xbf16> to vector<2x32xbf16>
    %145 = vector.shape_cast %140 : vector<2x32xbf16> to vector<1x1x2x32xbf16>
    tpu.vector_store %arg7[%c0_80, %c2_81, %c0_82, %c0_83], %145 {strides = array<i32>} : memref<1x8x2x32xbf16, #tpu.memory_space<vmem>>, vector<1x1x2x32xbf16>,
    %c3 = arith.constant 3 : index
    %c0_84 = arith.constant 0 : index
    %c0_85 = arith.constant 0 : index
    %146 = vector.load %arg3[%c3, %c0_84, %c0_85] : memref<8x2x16xbf16, #tpu.memory_space<vmem>>, vector<1x2x16xbf16>
    %147 = vector.shape_cast %146 : vector<1x2x16xbf16> to vector<2x16xbf16>
    %cst_86 = arith.constant dense<0.000000e+00> : vector<2x128xf32>
    %148 = tpu.matmul %147, %4, %cst_86 {dimension_numbers = #tpu.dot_dimension_numbers<[1], [0], [0], [1], [0, 0, 1, 1], [], []>} : vector<2x16xbf16>, vector<16x128xbf16>, vector<2x128xf32> -> vector<2x128xf32>
    %c0_87 = arith.constant 0 : index
    %c0_88 = arith.constant 0 : index
    %149 = vector.load %arg8[%c0_87, %c0_88] : memref<2x32xbf16, #tpu.memory_space<vmem>>, vector<2x32xbf16>
    %cst_89 = arith.constant dense<0.000000e+00> : vector<2x128xf32>
    %150 = tpu.matmul %149, %6, %cst_89 {dimension_numbers = #tpu.dot_dimension_numbers<[1], [0], [0], [1], [0, 0, 1, 1], [], []>} : vector<2x32xbf16>, vector<32x128xbf16>, vector<2x128xf32> -> vector<2x128xf32>
    %151 = arith.addf %148, %150 : vector<2x128xf32>
    %152 = arith.addf %151, %10 : vector<2x128xf32>
    %153 = vector.extract_strided_slice %152 {offsets = [0, 0], sizes = [2, 32], strides = [1, 1]} : vector<2x128xf32> to vector<2x32xf32>
    %cst_90 = arith.constant 5.000000e-01 : f32
    %154 = vector.broadcast %cst_90 : f32 to vector<2x32xf32>
    %155 = arith.mulf %154, %153 : vector<2x32xf32>
    %156 = math.tanh %155 : vector<2x32xf32>
    %cst_91 = arith.constant 1.000000e+00 : f32
    %157 = vector.broadcast %cst_91 : f32 to vector<2x32xf32>
    %158 = arith.addf %156, %157 : vector<2x32xf32>
    %cst_92 = arith.constant 5.000000e-01 : f32
    %159 = vector.broadcast %cst_92 : f32 to vector<2x32xf32>
    %160 = arith.mulf %159, %158 : vector<2x32xf32>
    %161 = vector.extract_strided_slice %152 {offsets = [0, 32], sizes = [2, 32], strides = [1, 1]} : vector<2x128xf32> to vector<2x32xf32>
    %cst_93 = arith.constant 5.000000e-01 : f32
    %162 = vector.broadcast %cst_93 : f32 to vector<2x32xf32>
    %163 = arith.mulf %162, %161 : vector<2x32xf32>
    %164 = math.tanh %163 : vector<2x32xf32>
    %cst_94 = arith.constant 1.000000e+00 : f32
    %165 = vector.broadcast %cst_94 : f32 to vector<2x32xf32>
    %166 = arith.addf %164, %165 : vector<2x32xf32>
    %cst_95 = arith.constant 5.000000e-01 : f32
    %167 = vector.broadcast %cst_95 : f32 to vector<2x32xf32>
    %168 = arith.mulf %167, %166 : vector<2x32xf32>
    %169 = vector.extract_strided_slice %152 {offsets = [0, 64], sizes = [2, 32], strides = [1, 1]} : vector<2x128xf32> to vector<2x32xf32>
    %170 = math.tanh %169 : vector<2x32xf32>
    %171 = vector.extract_strided_slice %152 {offsets = [0, 96], sizes = [2, 32], strides = [1, 1]} : vector<2x128xf32> to vector<2x32xf32>
    %cst_96 = arith.constant 5.000000e-01 : f32
    %172 = vector.broadcast %cst_96 : f32 to vector<2x32xf32>
    %173 = arith.mulf %172, %171 : vector<2x32xf32>
    %174 = math.tanh %173 : vector<2x32xf32>
    %cst_97 = arith.constant 1.000000e+00 : f32
    %175 = vector.broadcast %cst_97 : f32 to vector<2x32xf32>
    %176 = arith.addf %174, %175 : vector<2x32xf32>
    %cst_98 = arith.constant 5.000000e-01 : f32
    %177 = vector.broadcast %cst_98 : f32 to vector<2x32xf32>
    %178 = arith.mulf %177, %176 : vector<2x32xf32>
    %c0_99 = arith.constant 0 : index
    %c0_100 = arith.constant 0 : index
    %179 = vector.load %arg9[%c0_99, %c0_100] : memref<2x32xf32, #tpu.memory_space<vmem>>, vector<2x32xf32>
    %180 = arith.mulf %168, %179 : vector<2x32xf32>
    %181 = arith.mulf %160, %170 : vector<2x32xf32>
    %182 = arith.addf %180, %181 : vector<2x32xf32>
    %183 = math.tanh %182 : vector<2x32xf32>
    %184 = arith.mulf %178, %183 : vector<2x32xf32>
    %185 = arith.truncf %184 : vector<2x32xf32> to vector<2x32xbf16>
    %c0_101 = arith.constant 0 : index
    %c0_102 = arith.constant 0 : index
    %186 = vector.load %arg9[%c0_101, %c0_102] : memref<2x32xf32, #tpu.memory_space<vmem>>, vector<2x32xf32>
    tpu.vector_store %arg9[%c0_101, %c0_102], %182 {strides = array<i32>} : memref<2x32xf32, #tpu.memory_space<vmem>>, vector<2x32xf32>,
    %c0_103 = arith.constant 0 : index
    %c0_104 = arith.constant 0 : index
    %187 = vector.load %arg8[%c0_103, %c0_104] : memref<2x32xbf16, #tpu.memory_space<vmem>>, vector<2x32xbf16>
    tpu.vector_store %arg8[%c0_103, %c0_104], %185 {strides = array<i32>} : memref<2x32xbf16, #tpu.memory_space<vmem>>, vector<2x32xbf16>,
    %c0_105 = arith.constant 0 : index
    %c3_106 = arith.constant 3 : index
    %c0_107 = arith.constant 0 : index
    %c0_108 = arith.constant 0 : index
    %188 = vector.load %arg7[%c0_105, %c3_106, %c0_107, %c0_108] : memref<1x8x2x32xbf16, #tpu.memory_space<vmem>>, vector<1x1x2x32xbf16>
    %189 = vector.shape_cast %188 : vector<1x1x2x32xbf16> to vector<2x32xbf16>
    %190 = vector.shape_cast %185 : vector<2x32xbf16> to vector<1x1x2x32xbf16>
    tpu.vector_store %arg7[%c0_105, %c3_106, %c0_107, %c0_108], %190 {strides = array<i32>} : memref<1x8x2x32xbf16, #tpu.memory_space<vmem>>, vector<1x1x2x32xbf16>,
    %c4 = arith.constant 4 : index
    %c0_109 = arith.constant 0 : index
    %c0_110 = arith.constant 0 : index
    %191 = vector.load %arg3[%c4, %c0_109, %c0_110] : memref<8x2x16xbf16, #tpu.memory_space<vmem>>, vector<1x2x16xbf16>
    %192 = vector.shape_cast %191 : vector<1x2x16xbf16> to vector<2x16xbf16>
    %cst_111 = arith.constant dense<0.000000e+00> : vector<2x128xf32>
    %193 = tpu.matmul %192, %4, %cst_111 {dimension_numbers = #tpu.dot_dimension_numbers<[1], [0], [0], [1], [0, 0, 1, 1], [], []>} : vector<2x16xbf16>, vector<16x128xbf16>, vector<2x128xf32> -> vector<2x128xf32>
    %c0_112 = arith.constant 0 : index
    %c0_113 = arith.constant 0 : index
    %194 = vector.load %arg8[%c0_112, %c0_113] : memref<2x32xbf16, #tpu.memory_space<vmem>>, vector<2x32xbf16>
    %cst_114 = arith.constant dense<0.000000e+00> : vector<2x128xf32>
    %195 = tpu.matmul %194, %6, %cst_114 {dimension_numbers = #tpu.dot_dimension_numbers<[1], [0], [0], [1], [0, 0, 1, 1], [], []>} : vector<2x32xbf16>, vector<32x128xbf16>, vector<2x128xf32> -> vector<2x128xf32>
    %196 = arith.addf %193, %195 : vector<2x128xf32>
    %197 = arith.addf %196, %10 : vector<2x128xf32>
    %198 = vector.extract_strided_slice %197 {offsets = [0, 0], sizes = [2, 32], strides = [1, 1]} : vector<2x128xf32> to vector<2x32xf32>
    %cst_115 = arith.constant 5.000000e-01 : f32
    %199 = vector.broadcast %cst_115 : f32 to vector<2x32xf32>
    %200 = arith.mulf %199, %198 : vector<2x32xf32>
    %201 = math.tanh %200 : vector<2x32xf32>
    %cst_116 = arith.constant 1.000000e+00 : f32
    %202 = vector.broadcast %cst_116 : f32 to vector<2x32xf32>
    %203 = arith.addf %201, %202 : vector<2x32xf32>
    %cst_117 = arith.constant 5.000000e-01 : f32
    %204 = vector.broadcast %cst_117 : f32 to vector<2x32xf32>
    %205 = arith.mulf %204, %203 : vector<2x32xf32>
    %206 = vector.extract_strided_slice %197 {offsets = [0, 32], sizes = [2, 32], strides = [1, 1]} : vector<2x128xf32> to vector<2x32xf32>
    %cst_118 = arith.constant 5.000000e-01 : f32
    %207 = vector.broadcast %cst_118 : f32 to vector<2x32xf32>
    %208 = arith.mulf %207, %206 : vector<2x32xf32>
    %209 = math.tanh %208 : vector<2x32xf32>
    %cst_119 = arith.constant 1.000000e+00 : f32
    %210 = vector.broadcast %cst_119 : f32 to vector<2x32xf32>
    %211 = arith.addf %209, %210 : vector<2x32xf32>
    %cst_120 = arith.constant 5.000000e-01 : f32
    %212 = vector.broadcast %cst_120 : f32 to vector<2x32xf32>
    %213 = arith.mulf %212, %211 : vector<2x32xf32>
    %214 = vector.extract_strided_slice %197 {offsets = [0, 64], sizes = [2, 32], strides = [1, 1]} : vector<2x128xf32> to vector<2x32xf32>
    %215 = math.tanh %214 : vector<2x32xf32>
    %216 = vector.extract_strided_slice %197 {offsets = [0, 96], sizes = [2, 32], strides = [1, 1]} : vector<2x128xf32> to vector<2x32xf32>
    %cst_121 = arith.constant 5.000000e-01 : f32
    %217 = vector.broadcast %cst_121 : f32 to vector<2x32xf32>
    %218 = arith.mulf %217, %216 : vector<2x32xf32>
    %219 = math.tanh %218 : vector<2x32xf32>
    %cst_122 = arith.constant 1.000000e+00 : f32
    %220 = vector.broadcast %cst_122 : f32 to vector<2x32xf32>
    %221 = arith.addf %219, %220 : vector<2x32xf32>
    %cst_123 = arith.constant 5.000000e-01 : f32
    %222 = vector.broadcast %cst_123 : f32 to vector<2x32xf32>
    %223 = arith.mulf %222, %221 : vector<2x32xf32>
    %c0_124 = arith.constant 0 : index
    %c0_125 = arith.constant 0 : index
    %224 = vector.load %arg9[%c0_124, %c0_125] : memref<2x32xf32, #tpu.memory_space<vmem>>, vector<2x32xf32>
    %225 = arith.mulf %213, %224 : vector<2x32xf32>
    %226 = arith.mulf %205, %215 : vector<2x32xf32>
    %227 = arith.addf %225, %226 : vector<2x32xf32>
    %228 = math.tanh %227 : vector<2x32xf32>
    %229 = arith.mulf %223, %228 : vector<2x32xf32>
    %230 = arith.truncf %229 : vector<2x32xf32> to vector<2x32xbf16>
    %c0_126 = arith.constant 0 : index
    %c0_127 = arith.constant 0 : index
    %231 = vector.load %arg9[%c0_126, %c0_127] : memref<2x32xf32, #tpu.memory_space<vmem>>, vector<2x32xf32>
    tpu.vector_store %arg9[%c0_126, %c0_127], %227 {strides = array<i32>} : memref<2x32xf32, #tpu.memory_space<vmem>>, vector<2x32xf32>,
    %c0_128 = arith.constant 0 : index
    %c0_129 = arith.constant 0 : index
    %232 = vector.load %arg8[%c0_128, %c0_129] : memref<2x32xbf16, #tpu.memory_space<vmem>>, vector<2x32xbf16>
    tpu.vector_store %arg8[%c0_128, %c0_129], %230 {strides = array<i32>} : memref<2x32xbf16, #tpu.memory_space<vmem>>, vector<2x32xbf16>,
    %c0_130 = arith.constant 0 : index
    %c4_131 = arith.constant 4 : index
    %c0_132 = arith.constant 0 : index
    %c0_133 = arith.constant 0 : index
    %233 = vector.load %arg7[%c0_130, %c4_131, %c0_132, %c0_133] : memref<1x8x2x32xbf16, #tpu.memory_space<vmem>>, vector<1x1x2x32xbf16>
    %234 = vector.shape_cast %233 : vector<1x1x2x32xbf16> to vector<2x32xbf16>
    %235 = vector.shape_cast %230 : vector<2x32xbf16> to vector<1x1x2x32xbf16>
    tpu.vector_store %arg7[%c0_130, %c4_131, %c0_132, %c0_133], %235 {strides = array<i32>} : memref<1x8x2x32xbf16, #tpu.memory_space<vmem>>, vector<1x1x2x32xbf16>,
    %c5 = arith.constant 5 : index
    %c0_134 = arith.constant 0 : index
    %c0_135 = arith.constant 0 : index
    %236 = vector.load %arg3[%c5, %c0_134, %c0_135] : memref<8x2x16xbf16, #tpu.memory_space<vmem>>, vector<1x2x16xbf16>
    %237 = vector.shape_cast %236 : vector<1x2x16xbf16> to vector<2x16xbf16>
    %cst_136 = arith.constant dense<0.000000e+00> : vector<2x128xf32>
    %238 = tpu.matmul %237, %4, %cst_136 {dimension_numbers = #tpu.dot_dimension_numbers<[1], [0], [0], [1], [0, 0, 1, 1], [], []>} : vector<2x16xbf16>, vector<16x128xbf16>, vector<2x128xf32> -> vector<2x128xf32>
    %c0_137 = arith.constant 0 : index
    %c0_138 = arith.constant 0 : index
    %239 = vector.load %arg8[%c0_137, %c0_138] : memref<2x32xbf16, #tpu.memory_space<vmem>>, vector<2x32xbf16>
    %cst_139 = arith.constant dense<0.000000e+00> : vector<2x128xf32>
    %240 = tpu.matmul %239, %6, %cst_139 {dimension_numbers = #tpu.dot_dimension_numbers<[1], [0], [0], [1], [0, 0, 1, 1], [], []>} : vector<2x32xbf16>, vector<32x128xbf16>, vector<2x128xf32> -> vector<2x128xf32>
    %241 = arith.addf %238, %240 : vector<2x128xf32>
    %242 = arith.addf %241, %10 : vector<2x128xf32>
    %243 = vector.extract_strided_slice %242 {offsets = [0, 0], sizes = [2, 32], strides = [1, 1]} : vector<2x128xf32> to vector<2x32xf32>
    %cst_140 = arith.constant 5.000000e-01 : f32
    %244 = vector.broadcast %cst_140 : f32 to vector<2x32xf32>
    %245 = arith.mulf %244, %243 : vector<2x32xf32>
    %246 = math.tanh %245 : vector<2x32xf32>
    %cst_141 = arith.constant 1.000000e+00 : f32
    %247 = vector.broadcast %cst_141 : f32 to vector<2x32xf32>
    %248 = arith.addf %246, %247 : vector<2x32xf32>
    %cst_142 = arith.constant 5.000000e-01 : f32
    %249 = vector.broadcast %cst_142 : f32 to vector<2x32xf32>
    %250 = arith.mulf %249, %248 : vector<2x32xf32>
    %251 = vector.extract_strided_slice %242 {offsets = [0, 32], sizes = [2, 32], strides = [1, 1]} : vector<2x128xf32> to vector<2x32xf32>
    %cst_143 = arith.constant 5.000000e-01 : f32
    %252 = vector.broadcast %cst_143 : f32 to vector<2x32xf32>
    %253 = arith.mulf %252, %251 : vector<2x32xf32>
    %254 = math.tanh %253 : vector<2x32xf32>
    %cst_144 = arith.constant 1.000000e+00 : f32
    %255 = vector.broadcast %cst_144 : f32 to vector<2x32xf32>
    %256 = arith.addf %254, %255 : vector<2x32xf32>
    %cst_145 = arith.constant 5.000000e-01 : f32
    %257 = vector.broadcast %cst_145 : f32 to vector<2x32xf32>
    %258 = arith.mulf %257, %256 : vector<2x32xf32>
    %259 = vector.extract_strided_slice %242 {offsets = [0, 64], sizes = [2, 32], strides = [1, 1]} : vector<2x128xf32> to vector<2x32xf32>
    %260 = math.tanh %259 : vector<2x32xf32>
    %261 = vector.extract_strided_slice %242 {offsets = [0, 96], sizes = [2, 32], strides = [1, 1]} : vector<2x128xf32> to vector<2x32xf32>
    %cst_146 = arith.constant 5.000000e-01 : f32
    %262 = vector.broadcast %cst_146 : f32 to vector<2x32xf32>
    %263 = arith.mulf %262, %261 : vector<2x32xf32>
    %264 = math.tanh %263 : vector<2x32xf32>
    %cst_147 = arith.constant 1.000000e+00 : f32
    %265 = vector.broadcast %cst_147 : f32 to vector<2x32xf32>
    %266 = arith.addf %264, %265 : vector<2x32xf32>
    %cst_148 = arith.constant 5.000000e-01 : f32
    %267 = vector.broadcast %cst_148 : f32 to vector<2x32xf32>
    %268 = arith.mulf %267, %266 : vector<2x32xf32>
    %c0_149 = arith.constant 0 : index
    %c0_150 = arith.constant 0 : index
    %269 = vector.load %arg9[%c0_149, %c0_150] : memref<2x32xf32, #tpu.memory_space<vmem>>, vector<2x32xf32>
    %270 = arith.mulf %258, %269 : vector<2x32xf32>
    %271 = arith.mulf %250, %260 : vector<2x32xf32>
    %272 = arith.addf %270, %271 : vector<2x32xf32>
    %273 = math.tanh %272 : vector<2x32xf32>
    %274 = arith.mulf %268, %273 : vector<2x32xf32>
    %275 = arith.truncf %274 : vector<2x32xf32> to vector<2x32xbf16>
    %c0_151 = arith.constant 0 : index
    %c0_152 = arith.constant 0 : index
    %276 = vector.load %arg9[%c0_151, %c0_152] : memref<2x32xf32, #tpu.memory_space<vmem>>, vector<2x32xf32>
    tpu.vector_store %arg9[%c0_151, %c0_152], %272 {strides = array<i32>} : memref<2x32xf32, #tpu.memory_space<vmem>>, vector<2x32xf32>,
    %c0_153 = arith.constant 0 : index
    %c0_154 = arith.constant 0 : index
    %277 = vector.load %arg8[%c0_153, %c0_154] : memref<2x32xbf16, #tpu.memory_space<vmem>>, vector<2x32xbf16>
    tpu.vector_store %arg8[%c0_153, %c0_154], %275 {strides = array<i32>} : memref<2x32xbf16, #tpu.memory_space<vmem>>, vector<2x32xbf16>,
    %c0_155 = arith.constant 0 : index
    %c5_156 = arith.constant 5 : index
    %c0_157 = arith.constant 0 : index
    %c0_158 = arith.constant 0 : index
    %278 = vector.load %arg7[%c0_155, %c5_156, %c0_157, %c0_158] : memref<1x8x2x32xbf16, #tpu.memory_space<vmem>>, vector<1x1x2x32xbf16>
    %279 = vector.shape_cast %278 : vector<1x1x2x32xbf16> to vector<2x32xbf16>
    %280 = vector.shape_cast %275 : vector<2x32xbf16> to vector<1x1x2x32xbf16>
    tpu.vector_store %arg7[%c0_155, %c5_156, %c0_157, %c0_158], %280 {strides = array<i32>} : memref<1x8x2x32xbf16, #tpu.memory_space<vmem>>, vector<1x1x2x32xbf16>,
    %c6 = arith.constant 6 : index
    %c0_159 = arith.constant 0 : index
    %c0_160 = arith.constant 0 : index
    %281 = vector.load %arg3[%c6, %c0_159, %c0_160] : memref<8x2x16xbf16, #tpu.memory_space<vmem>>, vector<1x2x16xbf16>
    %282 = vector.shape_cast %281 : vector<1x2x16xbf16> to vector<2x16xbf16>
    %cst_161 = arith.constant dense<0.000000e+00> : vector<2x128xf32>
    %283 = tpu.matmul %282, %4, %cst_161 {dimension_numbers = #tpu.dot_dimension_numbers<[1], [0], [0], [1], [0, 0, 1, 1], [], []>} : vector<2x16xbf16>, vector<16x128xbf16>, vector<2x128xf32> -> vector<2x128xf32>
    %c0_162 = arith.constant 0 : index
    %c0_163 = arith.constant 0 : index
    %284 = vector.load %arg8[%c0_162, %c0_163] : memref<2x32xbf16, #tpu.memory_space<vmem>>, vector<2x32xbf16>
    %cst_164 = arith.constant dense<0.000000e+00> : vector<2x128xf32>
    %285 = tpu.matmul %284, %6, %cst_164 {dimension_numbers = #tpu.dot_dimension_numbers<[1], [0], [0], [1], [0, 0, 1, 1], [], []>} : vector<2x32xbf16>, vector<32x128xbf16>, vector<2x128xf32> -> vector<2x128xf32>
    %286 = arith.addf %283, %285 : vector<2x128xf32>
    %287 = arith.addf %286, %10 : vector<2x128xf32>
    %288 = vector.extract_strided_slice %287 {offsets = [0, 0], sizes = [2, 32], strides = [1, 1]} : vector<2x128xf32> to vector<2x32xf32>
    %cst_165 = arith.constant 5.000000e-01 : f32
    %289 = vector.broadcast %cst_165 : f32 to vector<2x32xf32>
    %290 = arith.mulf %289, %288 : vector<2x32xf32>
    %291 = math.tanh %290 : vector<2x32xf32>
    %cst_166 = arith.constant 1.000000e+00 : f32
    %292 = vector.broadcast %cst_166 : f32 to vector<2x32xf32>
    %293 = arith.addf %291, %292 : vector<2x32xf32>
    %cst_167 = arith.constant 5.000000e-01 : f32
    %294 = vector.broadcast %cst_167 : f32 to vector<2x32xf32>
    %295 = arith.mulf %294, %293 : vector<2x32xf32>
    %296 = vector.extract_strided_slice %287 {offsets = [0, 32], sizes = [2, 32], strides = [1, 1]} : vector<2x128xf32> to vector<2x32xf32>
    %cst_168 = arith.constant 5.000000e-01 : f32
    %297 = vector.broadcast %cst_168 : f32 to vector<2x32xf32>
    %298 = arith.mulf %297, %296 : vector<2x32xf32>
    %299 = math.tanh %298 : vector<2x32xf32>
    %cst_169 = arith.constant 1.000000e+00 : f32
    %300 = vector.broadcast %cst_169 : f32 to vector<2x32xf32>
    %301 = arith.addf %299, %300 : vector<2x32xf32>
    %cst_170 = arith.constant 5.000000e-01 : f32
    %302 = vector.broadcast %cst_170 : f32 to vector<2x32xf32>
    %303 = arith.mulf %302, %301 : vector<2x32xf32>
    %304 = vector.extract_strided_slice %287 {offsets = [0, 64], sizes = [2, 32], strides = [1, 1]} : vector<2x128xf32> to vector<2x32xf32>
    %305 = math.tanh %304 : vector<2x32xf32>
    %306 = vector.extract_strided_slice %287 {offsets = [0, 96], sizes = [2, 32], strides = [1, 1]} : vector<2x128xf32> to vector<2x32xf32>
    %cst_171 = arith.constant 5.000000e-01 : f32
    %307 = vector.broadcast %cst_171 : f32 to vector<2x32xf32>
    %308 = arith.mulf %307, %306 : vector<2x32xf32>
    %309 = math.tanh %308 : vector<2x32xf32>
    %cst_172 = arith.constant 1.000000e+00 : f32
    %310 = vector.broadcast %cst_172 : f32 to vector<2x32xf32>
    %311 = arith.addf %309, %310 : vector<2x32xf32>
    %cst_173 = arith.constant 5.000000e-01 : f32
    %312 = vector.broadcast %cst_173 : f32 to vector<2x32xf32>
    %313 = arith.mulf %312, %311 : vector<2x32xf32>
    %c0_174 = arith.constant 0 : index
    %c0_175 = arith.constant 0 : index
    %314 = vector.load %arg9[%c0_174, %c0_175] : memref<2x32xf32, #tpu.memory_space<vmem>>, vector<2x32xf32>
    %315 = arith.mulf %303, %314 : vector<2x32xf32>
    %316 = arith.mulf %295, %305 : vector<2x32xf32>
    %317 = arith.addf %315, %316 : vector<2x32xf32>
    %318 = math.tanh %317 : vector<2x32xf32>
    %319 = arith.mulf %313, %318 : vector<2x32xf32>
    %320 = arith.truncf %319 : vector<2x32xf32> to vector<2x32xbf16>
    %c0_176 = arith.constant 0 : index
    %c0_177 = arith.constant 0 : index
    %321 = vector.load %arg9[%c0_176, %c0_177] : memref<2x32xf32, #tpu.memory_space<vmem>>, vector<2x32xf32>
    tpu.vector_store %arg9[%c0_176, %c0_177], %317 {strides = array<i32>} : memref<2x32xf32, #tpu.memory_space<vmem>>, vector<2x32xf32>,
    %c0_178 = arith.constant 0 : index
    %c0_179 = arith.constant 0 : index
    %322 = vector.load %arg8[%c0_178, %c0_179] : memref<2x32xbf16, #tpu.memory_space<vmem>>, vector<2x32xbf16>
    tpu.vector_store %arg8[%c0_178, %c0_179], %320 {strides = array<i32>} : memref<2x32xbf16, #tpu.memory_space<vmem>>, vector<2x32xbf16>,
    %c0_180 = arith.constant 0 : index
    %c6_181 = arith.constant 6 : index
    %c0_182 = arith.constant 0 : index
    %c0_183 = arith.constant 0 : index
    %323 = vector.load %arg7[%c0_180, %c6_181, %c0_182, %c0_183] : memref<1x8x2x32xbf16, #tpu.memory_space<vmem>>, vector<1x1x2x32xbf16>
    %324 = vector.shape_cast %323 : vector<1x1x2x32xbf16> to vector<2x32xbf16>
    %325 = vector.shape_cast %320 : vector<2x32xbf16> to vector<1x1x2x32xbf16>
    tpu.vector_store %arg7[%c0_180, %c6_181, %c0_182, %c0_183], %325 {strides = array<i32>} : memref<1x8x2x32xbf16, #tpu.memory_space<vmem>>, vector<1x1x2x32xbf16>,
    %c7 = arith.constant 7 : index
    %c0_184 = arith.constant 0 : index
    %c0_185 = arith.constant 0 : index
    %326 = vector.load %arg3[%c7, %c0_184, %c0_185] : memref<8x2x16xbf16, #tpu.memory_space<vmem>>, vector<1x2x16xbf16>
    %327 = vector.shape_cast %326 : vector<1x2x16xbf16> to vector<2x16xbf16>
    %cst_186 = arith.constant dense<0.000000e+00> : vector<2x128xf32>
    %328 = tpu.matmul %327, %4, %cst_186 {dimension_numbers = #tpu.dot_dimension_numbers<[1], [0], [0], [1], [0, 0, 1, 1], [], []>} : vector<2x16xbf16>, vector<16x128xbf16>, vector<2x128xf32> -> vector<2x128xf32>
    %c0_187 = arith.constant 0 : index
    %c0_188 = arith.constant 0 : index
    %329 = vector.load %arg8[%c0_187, %c0_188] : memref<2x32xbf16, #tpu.memory_space<vmem>>, vector<2x32xbf16>
    %cst_189 = arith.constant dense<0.000000e+00> : vector<2x128xf32>
    %330 = tpu.matmul %329, %6, %cst_189 {dimension_numbers = #tpu.dot_dimension_numbers<[1], [0], [0], [1], [0, 0, 1, 1], [], []>} : vector<2x32xbf16>, vector<32x128xbf16>, vector<2x128xf32> -> vector<2x128xf32>
    %331 = arith.addf %328, %330 : vector<2x128xf32>
    %332 = arith.addf %331, %10 : vector<2x128xf32>
    %333 = vector.extract_strided_slice %332 {offsets = [0, 0], sizes = [2, 32], strides = [1, 1]} : vector<2x128xf32> to vector<2x32xf32>
    %cst_190 = arith.constant 5.000000e-01 : f32
    %334 = vector.broadcast %cst_190 : f32 to vector<2x32xf32>
    %335 = arith.mulf %334, %333 : vector<2x32xf32>
    %336 = math.tanh %335 : vector<2x32xf32>
    %cst_191 = arith.constant 1.000000e+00 : f32
    %337 = vector.broadcast %cst_191 : f32 to vector<2x32xf32>
    %338 = arith.addf %336, %337 : vector<2x32xf32>
    %cst_192 = arith.constant 5.000000e-01 : f32
    %339 = vector.broadcast %cst_192 : f32 to vector<2x32xf32>
    %340 = arith.mulf %339, %338 : vector<2x32xf32>
    %341 = vector.extract_strided_slice %332 {offsets = [0, 32], sizes = [2, 32], strides = [1, 1]} : vector<2x128xf32> to vector<2x32xf32>
    %cst_193 = arith.constant 5.000000e-01 : f32
    %342 = vector.broadcast %cst_193 : f32 to vector<2x32xf32>
    %343 = arith.mulf %342, %341 : vector<2x32xf32>
    %344 = math.tanh %343 : vector<2x32xf32>
    %cst_194 = arith.constant 1.000000e+00 : f32
    %345 = vector.broadcast %cst_194 : f32 to vector<2x32xf32>
    %346 = arith.addf %344, %345 : vector<2x32xf32>
    %cst_195 = arith.constant 5.000000e-01 : f32
    %347 = vector.broadcast %cst_195 : f32 to vector<2x32xf32>
    %348 = arith.mulf %347, %346 : vector<2x32xf32>
    %349 = vector.extract_strided_slice %332 {offsets = [0, 64], sizes = [2, 32], strides = [1, 1]} : vector<2x128xf32> to vector<2x32xf32>
    %350 = math.tanh %349 : vector<2x32xf32>
    %351 = vector.extract_strided_slice %332 {offsets = [0, 96], sizes = [2, 32], strides = [1, 1]} : vector<2x128xf32> to vector<2x32xf32>
    %cst_196 = arith.constant 5.000000e-01 : f32
    %352 = vector.broadcast %cst_196 : f32 to vector<2x32xf32>
    %353 = arith.mulf %352, %351 : vector<2x32xf32>
    %354 = math.tanh %353 : vector<2x32xf32>
    %cst_197 = arith.constant 1.000000e+00 : f32
    %355 = vector.broadcast %cst_197 : f32 to vector<2x32xf32>
    %356 = arith.addf %354, %355 : vector<2x32xf32>
    %cst_198 = arith.constant 5.000000e-01 : f32
    %357 = vector.broadcast %cst_198 : f32 to vector<2x32xf32>
    %358 = arith.mulf %357, %356 : vector<2x32xf32>
    %c0_199 = arith.constant 0 : index
    %c0_200 = arith.constant 0 : index
    %359 = vector.load %arg9[%c0_199, %c0_200] : memref<2x32xf32, #tpu.memory_space<vmem>>, vector<2x32xf32>
    %360 = arith.mulf %348, %359 : vector<2x32xf32>
    %361 = arith.mulf %340, %350 : vector<2x32xf32>
    %362 = arith.addf %360, %361 : vector<2x32xf32>
    %363 = math.tanh %362 : vector<2x32xf32>
    %364 = arith.mulf %358, %363 : vector<2x32xf32>
    %365 = arith.truncf %364 : vector<2x32xf32> to vector<2x32xbf16>
    %c0_201 = arith.constant 0 : index
    %c0_202 = arith.constant 0 : index
    %366 = vector.load %arg9[%c0_201, %c0_202] : memref<2x32xf32, #tpu.memory_space<vmem>>, vector<2x32xf32>
    tpu.vector_store %arg9[%c0_201, %c0_202], %362 {strides = array<i32>} : memref<2x32xf32, #tpu.memory_space<vmem>>, vector<2x32xf32>,
    %c0_203 = arith.constant 0 : index
    %c0_204 = arith.constant 0 : index
    %367 = vector.load %arg8[%c0_203, %c0_204] : memref<2x32xbf16, #tpu.memory_space<vmem>>, vector<2x32xbf16>
    tpu.vector_store %arg8[%c0_203, %c0_204], %365 {strides = array<i32>} : memref<2x32xbf16, #tpu.memory_space<vmem>>, vector<2x32xbf16>,
    %c0_205 = arith.constant 0 : index
    %c7_206 = arith.constant 7 : index
    %c0_207 = arith.constant 0 : index
    %c0_208 = arith.constant 0 : index
    %368 = vector.load %arg7[%c0_205, %c7_206, %c0_207, %c0_208] : memref<1x8x2x32xbf16, #tpu.memory_space<vmem>>, vector<1x1x2x32xbf16>
    %369 = vector.shape_cast %368 : vector<1x1x2x32xbf16> to vector<2x32xbf16>
    %370 = vector.shape_cast %365 : vector<2x32xbf16> to vector<1x1x2x32xbf16>
    tpu.vector_store %arg7[%c0_205, %c7_206, %c0_207, %c0_208], %370 {strides = array<i32>} : memref<1x8x2x32xbf16, #tpu.memory_space<vmem>>, vector<1x1x2x32xbf16>,
    return
  }
  func.func @transform_0(%arg0: i32, %arg1: i32, %arg2: i32) -> (i32, i32, i32) {
    %c1_i32 = arith.constant 1 : i32
    %0 = arith.subi %c1_i32, %arg0 : i32
    %1 = arith.muli %0, %arg2 : i32
    %c1_i32_0 = arith.constant 1 : i32
    %2 = arith.subi %c1_i32_0, %arg2 : i32
    %3 = arith.muli %arg0, %2 : i32
    %4 = arith.addi %1, %3 : i32
    %c0_i32 = arith.constant 0 : i32
    %c0_i32_1 = arith.constant 0 : i32
    return %4, %arg1, %c0_i32 : i32, i32, i32
  }
  func.func @transform_1(%arg0: i32, %arg1: i32, %arg2: i32) -> (i32, i32, i32) {
    %c0_i32 = arith.constant 0 : i32
    %c0_i32_0 = arith.constant 0 : i32
    %c0_i32_1 = arith.constant 0 : i32
    return %arg0, %c0_i32, %c0_i32_0 : i32, i32, i32
  }
  func.func @transform_2(%arg0: i32, %arg1: i32, %arg2: i32) -> (i32, i32, i32) {
    %c0_i32 = arith.constant 0 : i32
    %c0_i32_0 = arith.constant 0 : i32
    %c0_i32_1 = arith.constant 0 : i32
    return %arg0, %c0_i32, %c0_i32_0 : i32, i32, i32
  }
  func.func @transform_3(%arg0: i32, %arg1: i32, %arg2: i32) -> (i32, i32, i32) {
    %c0_i32 = arith.constant 0 : i32
    %c0_i32_0 = arith.constant 0 : i32
    %c0_i32_1 = arith.constant 0 : i32
    return %arg0, %c0_i32, %c0_i32_0 : i32, i32, i32
  }
  func.func @transform_4(%arg0: i32, %arg1: i32, %arg2: i32) -> (i32, i32, i32, i32) {
    %c1_i32 = arith.constant 1 : i32
    %0 = arith.subi %c1_i32, %arg0 : i32
    %1 = arith.muli %0, %arg2 : i32
    %c1_i32_0 = arith.constant 1 : i32
    %2 = arith.subi %c1_i32_0, %arg2 : i32
    %3 = arith.muli %arg0, %2 : i32
    %4 = arith.addi %1, %3 : i32
    %c0_i32 = arith.constant 0 : i32
    %c0_i32_1 = arith.constant 0 : i32
    return %arg0, %4, %arg1, %c0_i32 : i32, i32, i32, i32
  }
}

</mosaic_0001>

<bundles_post_ra>
// kernel: tpu_custom_call.1
= control target key start
LH: loop header
LB: loop body
LE: loop exit
PB: predicated region body
PF: predicated region fallthrough
CT: control target
= control target key end

     0   :  { %s1917_s0 = inlined_call_operand.hbm [shape: bf16[16,2,16], index: 0, kind: input, shape index: {}]   ;;  %s1918_s1 = inlined_call_operand.hbm [shape: bf16[1,16,128], index: 1, kind: input, shape index: {}]   ;;  %s1919_s2 = inlined_call_operand.hbm [shape: bf16[1,32,128], index: 2, kind: input, shape index: {}]   ;;  %s1920_s3 = inlined_call_operand.vmem [shape: f32[1,1,128], index: 3, kind: input, shape index: {}]   ;;  %s1921_s4 = inlined_call_operand.hbm [shape: bf16[1,16,2,32], index: 4, kind: output, shape index: {}]  }
   0x1   :  { %1922 = sst [smem:[#allocation14_spill]] %s1918_s1 }
   0x2   :  { %1923 = sst [smem:[#allocation15_spill]] %s1919_s2 }
   0x3   :  { %9 = vsyncpa [#allocation5], 0 }
   0x4   :  { %11 = vsyncpa [#allocation5 + $0x1], 0 }
   0x5   :  { %12 = vsyncpa [#allocation8], 0 }
   0x6   :  { %13 = vsyncpa [#allocation6], 0 }
   0x7   :  { %15 = vsyncpa [#allocation6 + $0x1], 0  ;;  %s1602_s15 = smov 0   ;;  %s1604_s16 = smov 0  }
   0x8   :  { %s1606_s17 = smov 0   ;;  %s1608_s18 = smov 0  }
   0x9   :  { %s1610_s19 = smov 0   ;;  %s1612_s20 = smov 0  }
   0xa LB: > { %s1179_s21 = sadd.s32 4294967295, %s1562_s20   ;;  %s1180_s22 = sadd.s32 4294967294, %s1562_s20   ;;  %s1562_s20 = sphi %s1612_s20, %s21_s20   ;;  %s1558_s19 = sphi %s1610_s19, %s1937_s19   ;;  %s1554_s18 = sphi %s1608_s18, %s1936_s18   ;;  %s1550_s17 = sphi %s1606_s17, %s1935_s17   ;;  %s1546_s16 = sphi %s1604_s16, %s1934_s16   ;;  %s1542_s15 = sphi %s1602_s15, %s1933_s15  }
   0xb   : > { %p72_p0 = scmp.ne.s32.totalorder %s1546_s16, %s1542_s15  ;;  %p1636_p1 = scmp.eq.s32.totalorder %s1179_s21, 0 }
   0xc   : > { %p1640_p2 = scmp.eq.s32.totalorder %s1179_s21, 1  ;;  %p194_p3 = scmp.eq.s32.totalorder %s1180_s22, 1 }
   0xd   : > { %p1646_p4 = por %p1636_p1, %p72_p0  ;;  %p1181_p5 = scmp.ge.s32.totalorder %s1562_s20, 1 }
   0xe   : > { %p1651_p6 = por %p194_p3, %p72_p0  ;;  %p201_p7 = scmp.lt.s32.totalorder %s1562_s20, 3 }
   0xf   : > { %s1928_s1 = sld [smem:[#allocation14_spill]]  ;;  %s1564_s5 = smov [#allocation7]  }
  0x10   : > { %p1659_p8 = pnand %p1181_p5, %p201_p7  ;;  %s217_s6 = sshll.u32 %s1564_s5, 4  ;;  %s218_s6 = int_to_ptr.vmem [resolvable:$true] %s217_s6 }
  0x11   : > { %p1185_p11 = scmp.ge.s32.totalorder %s1562_s20, 2  ;;  %s1930_s2 = sld [smem:[#allocation15_spill]] }
  0x12   : > { %p1255_p9 = pneg %p1659_p8  ;;  %s1565_s10 = smov 64  }
  0x13   : > { %s1566_s11 = smov 4   ;;  %s1567_s12 = smov [#allocation9]  }
  0x14   : > { %p1256_p10 = pnand %p1255_p9, %p1636_p1  ;;  %s234_s13 = sshll.u32 %s1567_s12, 4  ;;  %s235_s13 = int_to_ptr.vmem [resolvable:$true] %s234_s13 }
  0x15   : > { %s215_s29 = sshll.u32 %s1928_s1, 4  ;;  %s33_s14 = sadd.s32 1, %s1558_s19  ;;  %s216_s29 = int_to_ptr.hbm [resolvable:$true] %s215_s29 }
  0x16   : > { %1258 = dma.hbm_to_vmem [thread:$0]  (!%p1256_p10), %s216_s29, 128, %s218_s6, [#allocation8], %s1565_s10, %s1565_s10, %s1566_s11  }
  0x17   : > { %s232_s9 = sshll.u32 %s1930_s2, 4  ;;  %s59_s21 = sadd.s32 1, %s1550_s17  ;;  %s233_s9 = int_to_ptr.hbm [resolvable:$true] %s232_s9 }
  0x18   : > { %1261 = dma.hbm_to_vmem [thread:$0]  (!%p1256_p10), %s233_s9, 256, %s235_s13, [#allocation8], %s1565_s10, %s1565_s10, %s1566_s11  }
  0x19   : > { %p34_p12 = scmp.ge.s32.totalorder %s33_s14, 2  ;;  %p66_p13 = scmp.ne.s32.totalorder %s1550_s17, %s1546_s16 }
  0x1a   : > { %p67_p0 = scmp.eq.s32.totalorder %s1562_s20, 0  ;;  %p1272_p3 = scmp.lt.s32.totalorder %s1562_s20, 2 }
  0x1b   : > { %s1939_s14 = smov (%p34_p12, %s33_s14), 0  ;;  %p1685_p7 = por %p1640_p2, %p66_p13 }
  0x1c   : > { %p1679_p5 = por %p67_p0, %p66_p13  ;;  %s54_s28 = ssub.s32 %s1558_s19, %s1939_s14 }
  0x1d   : > { %s254_s29 = sand.u32 1, %s1550_s17   ;;  %p57_p9 = scmp.eq.s32.totalorder %s54_s28, 0 }
  0x1e   : > { %s1186_s5 = sshll.u32 %s254_s29, 3  ;;  %s1187_s6 = sshll.u32 %s1558_s19, 3 }
  0x1f   : > { %s1694_s7 = scalar_select %p57_p9, %s1550_s17, %s59_s21  }
  0x20   : > { %s268_s10 = scalar_lea.hbm %s1917_s0, %s1187_s6  ;;  %s258_s12 = scalar_lea.vmem [#allocation4], %s1186_s5 }
  0x21   : > { %s269_s11 = sshll.u32 %s268_s10, 4  ;;  %s271_s13 = sshll.u32 %s258_s12, 4  ;;  %s270_s11 = int_to_ptr.hbm [resolvable:$true] %s269_s11  ;;  %s272_s13 = int_to_ptr.vmem [resolvable:$true] %s271_s13 }
  0x22   : > { %p1263_p2 = pnand %p1272_p3, %p1679_p5  ;;  %s255_s24 = scalar_lea.sflag [#allocation5], %s254_s29 }
  0x23   : > { %s1568_s1 = smov 16   ;;  %s1569_s2 = smov 1  }
  0x24   : > { %1265 = dma.hbm_to_vmem [thread:$0]  (!%p1263_p2), %s270_s11, 128, %s272_s13, %s255_s24, %s1568_s1, %s1568_s1, %s1569_s2  }
  0x25   : > { %283 = sbr.rel (%p1659_p8) target bundleno = 4858 (0x12fa), region = 36  ;;  %s1706_s21 = sand.u32 (!%p1659_p8), 1, %s1546_s16  }
  0x26   : > { %s1189_s28 = sshll.u32 (!%p1659_p8), %s1706_s21, 3  ;;  %s286_s5 = scalar_lea.sflag (!%p1659_p8), [#allocation5], %s1706_s21 }
  0x27   : > { %s1710_s6 = scalar_lea.vmem (!%p1659_p8), [#allocation4], %s1189_s28 }
  0x2a   : > { %1529 = dma.done.wait (%p1646_p4), %s286_s5, 128  }
  0x2b   : > { %1531 = vsyncadd (%p1646_p4), %s286_s5, 4294967168 }
  0x2c   : > { %1533 = dma.done.wait (%p1636_p1), [#allocation8], 384  }
  0x2d   : > { %1535 = vsyncadd (%p1636_p1), [#allocation8], 4294966912  ;;  %s1720_s1 = scalar_lea.vmem [#allocation10], %s1189_s28  ;;  %p1193_p8 = scmp.ne.s32.totalorder %s1554_s18, 0 }
  0x2f   : > { %347 = sbr.rel (%p1193_p8) target bundleno = 55 (0x37), region = 52 }
  0x34   : > { %vm348_vm0 = vcmask 253952   ;;  %vm350_vm1 = vcmask 254976   ;;  %v1570_v0 = vmov 0   ;;  %v1571_v1 = vmov 0.0  }
  0x35   : > { %349 = vst.msk [vmem:[#allocation2] sm:$0x1] %vm348_vm0, %v1570_v0 }
  0x36   : > { %351 = vst.msk [vmem:[#allocation3] sm:$0x3] %vm350_vm1, %v1571_v1 }
  0x37 PF: > { %v1723_v2 = vld [vmem:[#allocation9 + $0x8] sm:$0xff]  ;;  %v1725_v3 = vld [vmem:[#allocation7] sm:$0xff]  ;;  %vm399_vm2 = vcmask 130048   ;;  %v1730_v5 = vld [vmem:[#allocation9] sm:$0xff]  ;;  %vm376_vm3 = vcmask 261120   ;;  %s1572_s25 = smov 64  }
  0x38   : > { %386 = vmatpush.bf16.msra.mxu0 %v1723_v2  ;;  %410 = vmatpush.bf16.msra.mxu1 %v1725_v3  ;;  %v362_v4 = vld [vmem:[%s1710_s6] sm:$0x1]  ;;  %v1751_v8 = vld [vmem:[%s1920_s3] ss:$0 sm:$0xff]  ;;  %s1573_s30 = smov 32   ;;  %vm453_vm4 = vcmask 1040384  }
  0x39   : > { %493 = vmatpush.bf16.msra.mxu3 %v1725_v3  ;;  %476 = vmatpush.bf16.msra.mxu2 %v1723_v2  ;;  %s1574_s22 = smov 96   ;;  %v1208_v32 = vld [vmem:[%s1710_s6 + $0x1] sm:$0x1]  ;;  %vm461_vm5 = vcmask 253952   ;;  %vm449_vm6 = vcmask 254976   ;;  %s1237_s29 = sshll.u32 %s1554_s18, 3 }
  0x3a   : > { %v1212_v56 = vld [vmem:[%s1710_s6 + $0x2] sm:$0x1]  ;;  %s1050_s10 = scalar_lea.hbm %s1921_s4, %s1237_s29  ;;  %s1051_s11 = sshll.u32 %s1720_s1, 4  ;;  %s1052_s11 = int_to_ptr.vmem [resolvable:$true] %s1051_s11 }
  0x3b   : > { %1207 = vmatmul.msk.bf16.vlgmr.msra.gmra.mxu1 %vm399_vm2, %v362_v4  ;;  %s1053_s12 = sshll.u32 %s1050_s10, 4  ;;  %s1032_s13 = scalar_lea.sflag [#allocation6], %s1706_s21  ;;  %s1054_s12 = int_to_ptr.hbm [resolvable:$true] %s1053_s12 }
  0x3c   : > { %557 = vmatpush.bf16.msrb.mxu1 %v1723_v2  ;;  %387 = vmatpush.bf16.msra.mxu0 %v1730_v5  ;;  %v363_v6 = vld [vmem:[#allocation2] sm:$0x1]  ;;  %s1490_s24 = sshra.s32 %s1054_s12, 4  ;;  %s1491_s24 = int_to_ptr.hbm [resolvable:$true] %s1490_s24 }
  0x3d   : > { %574 = vmatpush.bf16.msrb.mxu3 %v1725_v3  ;;  %477 = vmatpush.bf16.msra.mxu2 %v1730_v5  ;;  %v422_v15 = vld [vmem:[#allocation3] sm:$0x3]  ;;  %s1492_s28 = scalar_lea.hbm %s1491_s24, 8  ;;  %p1497_p12 = scmp.lt.s32.totalorder %s1491_s24, %s1921_s4 }
  0x3e   : > { %1210 = vmatmul.msk.bf16.vlgmr.msra.gmra.mxu3 %vm399_vm2, %v1208_v32  ;;  %p1493_p1 = scmp.ne.s32.totalorder %s1491_s24, %s1492_s28 }
  0x3f   : > { %1202 = vmatmul.msk.bf16.vlgmr.msra.gmra.mxu0 %vm376_vm3, %v363_v6 }
  0x40   : > { %638 = vmatpush.bf16.msrb.mxu0 %v1723_v2  ;;  %558 = vmatpush.bf16.msrb.mxu1 %v1730_v5  ;;  %p1494_p4 = pnand %p1493_p1, %p1685_p7 }
  0x41   : > { %655 = vmatpush.bf16.msrb.mxu2 %v1725_v3  ;;  %736 = vmatpush.bf16.msra.mxu3 %v1725_v3 }
  0x42   : > { %p1495_p10 = pneg %p1494_p4 }
  0x44   : > { %719 = vmatpush.bf16.msra.mxu1 %v1723_v2  ;;  %639 = vmatpush.bf16.msrb.mxu0 %v1730_v5 }
  0x48   : > { %800 = vmatpush.bf16.msra.mxu0 %v1723_v2  ;;  %720 = vmatpush.bf16.msra.mxu1 %v1730_v5 }
  0x4c   : > { %801 = vmatpush.bf16.msra.mxu0 %v1730_v5 }
  0x4e   : > { %1214 = vmatmul.msk.bf16.vlgmr.msrb.gmra.mxu3 %vm399_vm2, %v1212_v56 }
  0x4f   : > { %898 = vmatpush.bf16.msrb.mxu3 %v1725_v3 }
  0xb8   : > { %v412_v7 = vpop.f32.mrf.mxu1 }
  0xbc   : > { %v389_v9 = vpop.f32.mrf.mxu0 }
  0xbd   : > { %v413_v10 = vadd.f32 %v412_v7, %v389_v9 }
  0xbf   : > { %v416_v11 = vadd.f32 %v1751_v8, %v413_v10 }
  0xc0   : > { %v414_v12 = vpop.f32.mrf.mxu1 }
  0xc1   : > { %1338 = vtanh.f32 %v416_v11  ;;  %v417_v16 = vmul.f32 0.5, %v416_v11  ;;  %v495_v37 = vpop.f32.mrf.mxu3 }
  0xc3   : > { %1340 = vtanh.f32 %v417_v16 }
  0xc4   : > { %v391_v13 = vpop.f32.mrf.mxu0 }
  0xc7   : > { %v1339_v14 = vpop.eup %1338 }
  0xc8   : > { %429 = vrot.lane.b32.xlu0 %v1339_v14, %s1572_s25 }
  0xc9   : > { %v1341_v17 = vpop.eup %1340  ;;  %v497_v38 = vpop.f32.mrf.mxu3 }
  0xca   : > { %v419_v18 = vadd.f32 1.0, %v1341_v17 }
  0xcc   : > { %v420_v19 = vmul.f32 0.5, %v419_v18 }
  0xd0   : > { %424 = vrot.lane.b32.xlu0 %v422_v15, %s1573_s30 }
  0xd1   : > { %v576_v63 = vpop.f32.mrf.mxu3 }
  0xd9   : > { %v578_v1 = vpop.f32.mrf.mxu3 }
 0x13a   : > { %v430_v20 = vpop.permute.xlu0 %429 }
 0x13b   : > { %v432_v21 = vmul.f32 %v430_v20, %v420_v19 }
 0x13d   : > { %434 = vrot.lane.b32.xlu1 %v432_v21, %s1573_s30 }
 0x142   : > { %v425_v22 = vpop.permute.xlu0 %424 }
 0x143   : > { %v427_v23 = vmul.f32 %v425_v22, %v420_v19 }
 0x1af   : > { %v435_v24 = vpop.permute.xlu1 %434 }
 0x1b0   : > { %v437_v25 = vadd.f32 %v435_v24, %v427_v23  ;;  %v1216_v24 = vld [vmem:[%s1710_s6 + $0x3] sm:$0x1] }
 0x1b2   : > { %1342 = vtanh.f32 %v437_v25 }
 0x1b8   : > { %v1343_v26 = vpop.eup %1342 }
 0x1b9   : > { %440 = vrot.lane.b32.xlu1 %v1343_v26, %s1572_s25 }
 0x22b   : > { %v441_v27 = vpop.permute.xlu1 %440 }
 0x22c   : > { %v443_v28 = vmul.f32 %v441_v27, %v420_v19 }
 0x22e   : > { %v444_v29 = vpack.c.bf16 %v443_v28, %v443_v28 }
 0x230   : > { %v452_v30 = vrot.slane %v444_v29, 3 }
 0x232   : > { %v456_v31 = vsel %vm453_vm4, %v444_v29, %v452_v30 }
 0x233   : > { %458 = vrot.lane.b32.xlu2 %v456_v31, %s1573_s30 }
 0x23b   : > { %446 = vrot.lane.b32.xlu2 %v437_v25, %s1574_s22 }
 0x28d   : > { %v459_v33 = vpop.permute.xlu2 %458 }
 0x28e   : > { %462 = vst.msk [vmem:[#allocation2] sm:$0x1] %vm461_vm5, %v459_v33 }
 0x28f   : > { %463 = vst.msk [vmem:[%s1720_s1] sm:$0x1] %vm461_vm5, %v459_v33 }
 0x295   : > { %v447_v34 = vpop.permute.xlu2 %446  ;;  %v466_v35 = vld [vmem:[#allocation2] sm:$0x1] }
 0x296   : > { %450 = vst.msk [vmem:[#allocation3] sm:$0x3] %vm449_vm6, %v447_v34  ;;  %1209 = vmatmul.msk.bf16.vlgmr.msra.gmra.mxu2 %vm376_vm3, %v466_v35 }
 0x297   : > { %817 = vmatpush.bf16.msra.mxu2 %v1725_v3 }
 0x29d   : > { %v505_v36 = vld [vmem:[#allocation3] sm:$0x3] }
 0x29e   : > { %507 = vrot.lane.b32.xlu1 %v505_v36, %s1573_s30 }
 0x2a6   : > { %1218 = vmatmul.msk.bf16.vlgmr.msrb.gmra.mxu2 %vm399_vm2, %v1216_v24 }
 0x2a7   : > { %979 = vmatpush.bf16.msrb.mxu2 %v1725_v3 }
 0x310   : > { %v508_v50 = vpop.permute.xlu1 %507 }
 0x319   : > { %v479_v39 = vpop.f32.mrf.mxu2 }
 0x31a   : > { %v496_v40 = vadd.f32 %v495_v37, %v479_v39 }
 0x31c   : > { %v499_v41 = vadd.f32 %v1751_v8, %v496_v40 }
 0x31e   : > { %1344 = vtanh.f32 %v499_v41  ;;  %v500_v44 = vmul.f32 0.5, %v499_v41 }
 0x320   : > { %1346 = vtanh.f32 %v500_v44 }
 0x321   : > { %v481_v42 = vpop.f32.mrf.mxu2 }
 0x324   : > { %v1345_v43 = vpop.eup %1344 }
 0x325   : > { %512 = vrot.lane.b32.xlu0 %v1345_v43, %s1572_s25 }
 0x326   : > { %v1347_v45 = vpop.eup %1346 }
 0x327   : > { %v502_v46 = vadd.f32 1.0, %v1347_v45 }
 0x329   : > { %v503_v47 = vmul.f32 0.5, %v502_v46  ;;  %v657_v31 = vpop.f32.mrf.mxu2 }
 0x32b   : > { %v510_v51 = vmul.f32 %v508_v50, %v503_v47 }
 0x331   : > { %v659_v33 = vpop.f32.mrf.mxu2 }
 0x397   : > { %v513_v48 = vpop.permute.xlu0 %512 }
 0x398   : > { %v515_v49 = vmul.f32 %v513_v48, %v503_v47 }
 0x39a   : > { %517 = vrot.lane.b32.xlu2 %v515_v49, %s1573_s30  ;;  %v1220_v49 = vld [vmem:[%s1710_s6 + $0x4] sm:$0x1] }
 0x39b   : > { %1222 = vmatmul.msk.bf16.vlgmr.msra.gmra.mxu3 %vm399_vm2, %v1220_v49 }
 0x3f4   : > { %v518_v52 = vpop.permute.xlu2 %517 }
 0x3f5   : > { %v520_v53 = vadd.f32 %v518_v52, %v510_v51 }
 0x3f7   : > { %1348 = vtanh.f32 %v520_v53  ;;  %529 = vrot.lane.b32.xlu2 %v520_v53, %s1574_s22 }
 0x3fd   : > { %v1349_v54 = vpop.eup %1348 }
 0x3fe   : > { %523 = vrot.lane.b32.xlu0 %v1349_v54, %s1572_s25 }
 0x41e   : > { %v738_v56 = vpop.f32.mrf.mxu3 }
 0x451   : > { %v530_v55 = vpop.permute.xlu2 %529 }
 0x452   : > { %532 = vst.msk [vmem:[#allocation3] sm:$0x3] %vm449_vm6, %v530_v55 }
 0x459   : > { %v586_v62 = vld [vmem:[#allocation3] sm:$0x3] }
 0x470   : > { %v524_v57 = vpop.permute.xlu0 %523 }
 0x471   : > { %v526_v58 = vmul.f32 %v524_v57, %v503_v47 }
 0x473   : > { %v527_v59 = vpack.c.bf16 %v526_v58, %v526_v58  ;;  %v740_v58 = vpop.f32.mrf.mxu3 }
 0x475   : > { %v534_v60 = vrot.slane %v527_v59, 3 }
 0x477   : > { %v537_v61 = vsel %vm453_vm4, %v527_v59, %v534_v60 }
 0x478   : > { %539 = vrot.lane.b32.xlu1 %v537_v61, %s1573_s30 }
 0x480   : > { %588 = vrot.lane.b32.xlu1 %v586_v62, %s1573_s30 }
 0x4ea   : > { %v540_v0 = vpop.permute.xlu1 %539 }
 0x4eb   : > { %542 = vst.msk [vmem:[#allocation2] sm:$0x1] %vm461_vm5, %v540_v0 }
 0x4ec   : > { %1211 = vst.msk [vmem:[%s1720_s1 + $0x1] sm:$0x1] %vm461_vm5, %v540_v0 }
 0x4f2   : > { %v547_v4 = vld [vmem:[#allocation2] sm:$0x1]  ;;  %v589_v18 = vpop.permute.xlu1 %588 }
 0x4f3   : > { %1213 = vmatmul.msk.bf16.vlgmr.msrb.gmra.mxu1 %vm376_vm3, %v547_v4 }
 0x4f4   : > { %881 = vmatpush.bf16.msrb.mxu1 %v1723_v2 }
 0x4f8   : > { %882 = vmatpush.bf16.msrb.mxu1 %v1730_v5 }
 0x570   : > { %v560_v6 = vpop.f32.mrf.mxu1 }
 0x571   : > { %v577_v7 = vadd.f32 %v576_v63, %v560_v6 }
 0x573   : > { %v580_v9 = vadd.f32 %v1751_v8, %v577_v7 }
 0x575   : > { %1350 = vtanh.f32 %v580_v9  ;;  %v581_v12 = vmul.f32 0.5, %v580_v9 }
 0x577   : > { %1352 = vtanh.f32 %v581_v12 }
 0x578   : > { %v562_v10 = vpop.f32.mrf.mxu1 }
 0x57b   : > { %v1351_v11 = vpop.eup %1350 }
 0x57c   : > { %593 = vrot.lane.b32.xlu0 %v1351_v11, %s1572_s25 }
 0x57d   : > { %v1353_v13 = vpop.eup %1352 }
 0x57e   : > { %v583_v14 = vadd.f32 1.0, %v1353_v13 }
 0x580   : > { %v584_v15 = vmul.f32 0.5, %v583_v14 }
 0x582   : > { %v591_v19 = vmul.f32 %v589_v18, %v584_v15 }
 0x5ee   : > { %v594_v16 = vpop.permute.xlu0 %593 }
 0x5ef   : > { %v596_v17 = vmul.f32 %v594_v16, %v584_v15 }
 0x5f1   : > { %598 = vrot.lane.b32.xlu2 %v596_v17, %s1573_s30  ;;  %v1224_v17 = vld [vmem:[%s1710_s6 + $0x5] sm:$0x1] }
 0x5f2   : > { %1226 = vmatmul.msk.bf16.vlgmr.msra.gmra.mxu2 %vm399_vm2, %v1224_v17 }
 0x64b   : > { %v599_v20 = vpop.permute.xlu2 %598 }
 0x64c   : > { %v601_v21 = vadd.f32 %v599_v20, %v591_v19 }
 0x64e   : > { %1354 = vtanh.f32 %v601_v21  ;;  %610 = vrot.lane.b32.xlu2 %v601_v21, %s1574_s22 }
 0x654   : > { %v1355_v22 = vpop.eup %1354 }
 0x655   : > { %604 = vrot.lane.b32.xlu0 %v1355_v22, %s1572_s25 }
 0x675   : > { %v819_v24 = vpop.f32.mrf.mxu2 }
 0x6a8   : > { %v611_v23 = vpop.permute.xlu2 %610 }
 0x6a9   : > { %613 = vst.msk [vmem:[#allocation3] sm:$0x3] %vm449_vm6, %v611_v23 }
 0x6b0   : > { %v667_v30 = vld [vmem:[#allocation3] sm:$0x3] }
 0x6c7   : > { %v605_v25 = vpop.permute.xlu0 %604 }
 0x6c8   : > { %v607_v26 = vmul.f32 %v605_v25, %v584_v15 }
 0x6ca   : > { %v608_v27 = vpack.c.bf16 %v607_v26, %v607_v26  ;;  %v821_v26 = vpop.f32.mrf.mxu2 }
 0x6cc   : > { %v615_v28 = vrot.slane %v608_v27, 3 }
 0x6ce   : > { %v618_v29 = vsel %vm453_vm4, %v608_v27, %v615_v28 }
 0x6cf   : > { %620 = vrot.lane.b32.xlu1 %v618_v29, %s1573_s30 }
 0x6d7   : > { %669 = vrot.lane.b32.xlu1 %v667_v30, %s1573_s30 }
 0x741   : > { %v621_v32 = vpop.permute.xlu1 %620 }
 0x742   : > { %623 = vst.msk [vmem:[#allocation2] sm:$0x1] %vm461_vm5, %v621_v32 }
 0x743   : > { %1215 = vst.msk [vmem:[%s1720_s1 + $0x2] sm:$0x1] %vm461_vm5, %v621_v32 }
 0x749   : > { %v628_v34 = vld [vmem:[#allocation2] sm:$0x1] }
 0x74a   : > { %1217 = vmatmul.msk.bf16.vlgmr.msrb.gmra.mxu0 %vm376_vm3, %v628_v34 }
 0x74b   : > { %962 = vmatpush.bf16.msrb.mxu0 %v1723_v2  ;;  %v670_v2 = vpop.permute.xlu1 %669 }
 0x74f   : > { %963 = vmatpush.bf16.msrb.mxu0 %v1730_v5 }
 0x7c7   : > { %v641_v3 = vpop.f32.mrf.mxu0 }
 0x7c8   : > { %v658_v35 = vadd.f32 %v657_v31, %v641_v3 }
 0x7ca   : > { %v661_v36 = vadd.f32 %v1751_v8, %v658_v35 }
 0x7cc   : > { %1356 = vtanh.f32 %v661_v36  ;;  %v662_v39 = vmul.f32 0.5, %v661_v36 }
 0x7ce   : > { %1358 = vtanh.f32 %v662_v39 }
 0x7cf   : > { %v643_v37 = vpop.f32.mrf.mxu0 }
 0x7d2   : > { %v1357_v38 = vpop.eup %1356 }
 0x7d3   : > { %674 = vrot.lane.b32.xlu0 %v1357_v38, %s1572_s25 }
 0x7d4   : > { %v1359_v40 = vpop.eup %1358 }
 0x7d5   : > { %v664_v41 = vadd.f32 1.0, %v1359_v40 }
 0x7d7   : > { %v665_v42 = vmul.f32 0.5, %v664_v41 }
 0x7d9   : > { %v672_v5 = vmul.f32 %v670_v2, %v665_v42 }
 0x845   : > { %v675_v43 = vpop.permute.xlu0 %674 }
 0x846   : > { %v677_v44 = vmul.f32 %v675_v43, %v665_v42 }
 0x848   : > { %679 = vrot.lane.b32.xlu2 %v677_v44, %s1573_s30  ;;  %v1228_v44 = vld [vmem:[%s1710_s6 + $0x6] sm:$0x1] }
 0x849   : > { %1230 = vmatmul.msk.bf16.vlgmr.msrb.gmra.mxu3 %vm399_vm2, %v1228_v44 }
 0x8a2   : > { %v680_v45 = vpop.permute.xlu2 %679 }
 0x8a3   : > { %v682_v46 = vadd.f32 %v680_v45, %v672_v5 }
 0x8a5   : > { %1360 = vtanh.f32 %v682_v46  ;;  %691 = vrot.lane.b32.xlu2 %v682_v46, %s1574_s22 }
 0x8ab   : > { %v1361_v47 = vpop.eup %1360 }
 0x8ac   : > { %685 = vrot.lane.b32.xlu0 %v1361_v47, %s1572_s25 }
 0x8cc   : > { %v900_v49 = vpop.f32.mrf.mxu3 }
 0x8ff   : > { %v692_v48 = vpop.permute.xlu2 %691 }
 0x900   : > { %694 = vst.msk [vmem:[#allocation3] sm:$0x3] %vm449_vm6, %v692_v48 }
 0x907   : > { %v748_v55 = vld [vmem:[#allocation3] sm:$0x3] }
 0x91e   : > { %v686_v50 = vpop.permute.xlu0 %685 }
 0x91f   : > { %v688_v51 = vmul.f32 %v686_v50, %v665_v42 }
 0x921   : > { %v689_v52 = vpack.c.bf16 %v688_v51, %v688_v51  ;;  %v902_v51 = vpop.f32.mrf.mxu3 }
 0x923   : > { %v696_v53 = vrot.slane %v689_v52, 3 }
 0x925   : > { %v699_v54 = vsel %vm453_vm4, %v689_v52, %v696_v53 }
 0x926   : > { %701 = vrot.lane.b32.xlu1 %v699_v54, %s1573_s30 }
 0x92e   : > { %750 = vrot.lane.b32.xlu1 %v748_v55, %s1573_s30 }
 0x998   : > { %v702_v57 = vpop.permute.xlu1 %701 }
 0x999   : > { %704 = vst.msk [vmem:[#allocation2] sm:$0x1] %vm461_vm5, %v702_v57 }
 0x99a   : > { %1219 = vst.msk [vmem:[%s1720_s1 + $0x3] sm:$0x1] %vm461_vm5, %v702_v57 }
 0x9a0   : > { %v709_v59 = vld [vmem:[#allocation2] sm:$0x1]  ;;  %v751_v11 = vpop.permute.xlu1 %750 }
 0x9a1   : > { %1221 = vmatmul.msk.bf16.vlgmr.msra.gmra.mxu1 %vm376_vm3, %v709_v59 }
 0xa1e   : > { %v722_v60 = vpop.f32.mrf.mxu1 }
 0xa1f   : > { %v739_v61 = vadd.f32 %v738_v56, %v722_v60 }
 0xa21   : > { %v742_v62 = vadd.f32 %v1751_v8, %v739_v61 }
 0xa23   : > { %1362 = vtanh.f32 %v742_v62  ;;  %v743_v1 = vmul.f32 0.5, %v742_v62 }
 0xa25   : > { %1364 = vtanh.f32 %v743_v1 }
 0xa26   : > { %v724_v63 = vpop.f32.mrf.mxu1 }
 0xa29   : > { %v1363_v0 = vpop.eup %1362 }
 0xa2a   : > { %755 = vrot.lane.b32.xlu0 %v1363_v0, %s1572_s25 }
 0xa2b   : > { %v1365_v4 = vpop.eup %1364 }
 0xa2c   : > { %v745_v6 = vadd.f32 1.0, %v1365_v4 }
 0xa2e   : > { %v746_v7 = vmul.f32 0.5, %v745_v6 }
 0xa30   : > { %v753_v12 = vmul.f32 %v751_v11, %v746_v7 }
 0xa9c   : > { %v756_v9 = vpop.permute.xlu0 %755 }
 0xa9d   : > { %v758_v10 = vmul.f32 %v756_v9, %v746_v7 }
 0xa9f   : > { %760 = vrot.lane.b32.xlu2 %v758_v10, %s1573_s30  ;;  %v1232_v10 = vld [vmem:[%s1710_s6 + $0x7] sm:$0x1]  ;;  %s1496_s6 = scalar_lea.hbm %s1921_s4, 16 }
 0xaa0   : > { %1234 = vmatmul.msk.bf16.vlgmr.msrb.gmra.mxu2 %vm399_vm2, %v1232_v10  ;;  %p1498_p13 = scmp.lt.s32.totalorder %s1496_s6, %s1492_s28 }
 0xaa2   : > { %p1499_p0 = por %p1498_p13, %p1497_p12 }
 0xaa4   : > { %p1500_p3 = pnand %p1499_p0, %p1495_p10 }
 0xaf9   : > { %v761_v13 = vpop.permute.xlu2 %760 }
 0xafa   : > { %v763_v14 = vadd.f32 %v761_v13, %v753_v12 }
 0xafc   : > { %1366 = vtanh.f32 %v763_v14  ;;  %772 = vrot.lane.b32.xlu2 %v763_v14, %s1574_s22 }
 0xb02   : > { %v1367_v15 = vpop.eup %1366 }
 0xb03   : > { %766 = vrot.lane.b32.xlu0 %v1367_v15, %s1572_s25 }
 0xb23   : > { %v981_v17 = vpop.f32.mrf.mxu2 }
 0xb56   : > { %v773_v16 = vpop.permute.xlu2 %772 }
 0xb57   : > { %775 = vst.msk [vmem:[#allocation3] sm:$0x3] %vm449_vm6, %v773_v16 }
 0xb5e   : > { %v829_v23 = vld [vmem:[#allocation3] sm:$0x3] }
 0xb75   : > { %v767_v18 = vpop.permute.xlu0 %766 }
 0xb76   : > { %v769_v19 = vmul.f32 %v767_v18, %v746_v7 }
 0xb78   : > { %v770_v20 = vpack.c.bf16 %v769_v19, %v769_v19  ;;  %v983_v19 = vpop.f32.mrf.mxu2 }
 0xb7a   : > { %v777_v21 = vrot.slane %v770_v20, 3 }
 0xb7c   : > { %v780_v22 = vsel %vm453_vm4, %v770_v20, %v777_v21 }
 0xb7d   : > { %782 = vrot.lane.b32.xlu1 %v780_v22, %s1573_s30 }
 0xb85   : > { %831 = vrot.lane.b32.xlu1 %v829_v23, %s1573_s30 }
 0xbef   : > { %v783_v25 = vpop.permute.xlu1 %782 }
 0xbf0   : > { %785 = vst.msk [vmem:[#allocation2] sm:$0x1] %vm461_vm5, %v783_v25 }
 0xbf1   : > { %1223 = vst.msk [vmem:[%s1720_s1 + $0x4] sm:$0x1] %vm461_vm5, %v783_v25 }
 0xbf7   : > { %v790_v27 = vld [vmem:[#allocation2] sm:$0x1]  ;;  %v832_v38 = vpop.permute.xlu1 %831 }
 0xbf8   : > { %1225 = vmatmul.msk.bf16.vlgmr.msra.gmra.mxu0 %vm376_vm3, %v790_v27 }
 0xc75   : > { %v803_v28 = vpop.f32.mrf.mxu0 }
 0xc76   : > { %v820_v29 = vadd.f32 %v819_v24, %v803_v28 }
 0xc78   : > { %v823_v30 = vadd.f32 %v1751_v8, %v820_v29 }
 0xc7a   : > { %1368 = vtanh.f32 %v823_v30  ;;  %v824_v33 = vmul.f32 0.5, %v823_v30 }
 0xc7c   : > { %1370 = vtanh.f32 %v824_v33 }
 0xc7d   : > { %v805_v31 = vpop.f32.mrf.mxu0 }
 0xc80   : > { %v1369_v32 = vpop.eup %1368 }
 0xc81   : > { %836 = vrot.lane.b32.xlu0 %v1369_v32, %s1572_s25 }
 0xc82   : > { %v1371_v34 = vpop.eup %1370 }
 0xc83   : > { %v826_v3 = vadd.f32 1.0, %v1371_v34 }
 0xc85   : > { %v827_v35 = vmul.f32 0.5, %v826_v3 }
 0xc87   : > { %v834_v39 = vmul.f32 %v832_v38, %v827_v35 }
 0xcf3   : > { %v837_v36 = vpop.permute.xlu0 %836 }
 0xcf4   : > { %v839_v37 = vmul.f32 %v837_v36, %v827_v35 }
 0xcf6   : > { %841 = vrot.lane.b32.xlu2 %v839_v37, %s1573_s30 }
 0xd50   : > { %v842_v40 = vpop.permute.xlu2 %841 }
 0xd51   : > { %v844_v41 = vadd.f32 %v842_v40, %v834_v39 }
 0xd53   : > { %1372 = vtanh.f32 %v844_v41  ;;  %853 = vrot.lane.b32.xlu2 %v844_v41, %s1574_s22 }
 0xd59   : > { %v1373_v42 = vpop.eup %1372 }
 0xd5a   : > { %847 = vrot.lane.b32.xlu0 %v1373_v42, %s1572_s25 }
 0xdad   : > { %v854_v43 = vpop.permute.xlu2 %853 }
 0xdae   : > { %856 = vst.msk [vmem:[#allocation3] sm:$0x3] %vm449_vm6, %v854_v43 }
 0xdb5   : > { %v910_v48 = vld [vmem:[#allocation3] sm:$0x3] }
 0xdcc   : > { %v848_v2 = vpop.permute.xlu0 %847 }
 0xdcd   : > { %v850_v5 = vmul.f32 %v848_v2, %v827_v35 }
 0xdcf   : > { %v851_v45 = vpack.c.bf16 %v850_v5, %v850_v5 }
 0xdd1   : > { %v858_v46 = vrot.slane %v851_v45, 3 }
 0xdd3   : > { %v861_v47 = vsel %vm453_vm4, %v851_v45, %v858_v46 }
 0xdd4   : > { %863 = vrot.lane.b32.xlu1 %v861_v47, %s1573_s30 }
 0xddc   : > { %912 = vrot.lane.b32.xlu1 %v910_v48, %s1573_s30 }
 0xe46   : > { %v864_v50 = vpop.permute.xlu1 %863 }
 0xe47   : > { %866 = vst.msk [vmem:[#allocation2] sm:$0x1] %vm461_vm5, %v864_v50 }
 0xe48   : > { %1227 = vst.msk [vmem:[%s1720_s1 + $0x5] sm:$0x1] %vm461_vm5, %v864_v50 }
 0xe4e   : > { %v871_v52 = vld [vmem:[#allocation2] sm:$0x1]  ;;  %v913_v0 = vpop.permute.xlu1 %912 }
 0xe4f   : > { %1229 = vmatmul.msk.bf16.vlgmr.msrb.gmra.mxu1 %vm376_vm3, %v871_v52 }
 0xecc   : > { %v884_v53 = vpop.f32.mrf.mxu1 }
 0xecd   : > { %v901_v54 = vadd.f32 %v900_v49, %v884_v53 }
 0xecf   : > { %v904_v55 = vadd.f32 %v1751_v8, %v901_v54 }
 0xed1   : > { %1374 = vtanh.f32 %v904_v55  ;;  %v905_v58 = vmul.f32 0.5, %v904_v55 }
 0xed3   : > { %1376 = vtanh.f32 %v905_v58 }
 0xed4   : > { %v886_v56 = vpop.f32.mrf.mxu1 }
 0xed7   : > { %v1375_v57 = vpop.eup %1374 }
 0xed8   : > { %917 = vrot.lane.b32.xlu0 %v1375_v57, %s1572_s25 }
 0xed9   : > { %v1377_v59 = vpop.eup %1376 }
 0xeda   : > { %v907_v60 = vadd.f32 1.0, %v1377_v59 }
 0xedc   : > { %v908_v61 = vmul.f32 0.5, %v907_v60 }
 0xede   : > { %v915_v1 = vmul.f32 %v913_v0, %v908_v61 }
 0xf4a   : > { %v918_v62 = vpop.permute.xlu0 %917 }
 0xf4b   : > { %v920_v63 = vmul.f32 %v918_v62, %v908_v61 }
 0xf4d   : > { %922 = vrot.lane.b32.xlu2 %v920_v63, %s1573_s30 }
 0xfa7   : > { %v923_v4 = vpop.permute.xlu2 %922 }
 0xfa8   : > { %v925_v6 = vadd.f32 %v923_v4, %v915_v1 }
 0xfaa   : > { %1378 = vtanh.f32 %v925_v6  ;;  %934 = vrot.lane.b32.xlu2 %v925_v6, %s1574_s22 }
 0xfb0   : > { %v1379_v7 = vpop.eup %1378 }
 0xfb1   : > { %928 = vrot.lane.b32.xlu0 %v1379_v7, %s1572_s25 }
0x1004   : > { %v935_v9 = vpop.permute.xlu2 %934 }
0x1005   : > { %937 = vst.msk [vmem:[#allocation3] sm:$0x3] %vm449_vm6, %v935_v9 }
0x100c   : > { %v991_v16 = vld [vmem:[#allocation3] sm:$0x3] }
0x1023   : > { %v929_v11 = vpop.permute.xlu0 %928 }
0x1024   : > { %v931_v12 = vmul.f32 %v929_v11, %v908_v61 }
0x1026   : > { %v932_v13 = vpack.c.bf16 %v931_v12, %v931_v12 }
0x1028   : > { %v939_v14 = vrot.slane %v932_v13, 3 }
0x102a   : > { %v942_v15 = vsel %vm453_vm4, %v932_v13, %v939_v14 }
0x102b   : > { %944 = vrot.lane.b32.xlu1 %v942_v15, %s1573_s30 }
0x1033   : > { %993 = vrot.lane.b32.xlu1 %v991_v16, %s1573_s30 }
0x109d   : > { %v945_v18 = vpop.permute.xlu1 %944 }
0x109e   : > { %947 = vst.msk [vmem:[#allocation2] sm:$0x1] %vm461_vm5, %v945_v18 }
0x109f   : > { %1231 = vst.msk [vmem:[%s1720_s1 + $0x6] sm:$0x1] %vm461_vm5, %v945_v18 }
0x10a5   : > { %v952_v20 = vld [vmem:[#allocation2] sm:$0x1]  ;;  %v994_v32 = vpop.permute.xlu1 %993 }
0x10a6   : > { %1233 = vmatmul.msk.bf16.vlgmr.msrb.gmra.mxu0 %vm376_vm3, %v952_v20 }
0x1123   : > { %v965_v21 = vpop.f32.mrf.mxu0 }
0x1124   : > { %v982_v22 = vadd.f32 %v981_v17, %v965_v21 }
0x1126   : > { %v985_v23 = vadd.f32 %v1751_v8, %v982_v22 }
0x1128   : > { %1380 = vtanh.f32 %v985_v23  ;;  %v986_v26 = vmul.f32 0.5, %v985_v23 }
0x112a   : > { %1382 = vtanh.f32 %v986_v26 }
0x112b   : > { %v967_v24 = vpop.f32.mrf.mxu0 }
0x112e   : > { %v1381_v25 = vpop.eup %1380 }
0x112f   : > { %998 = vrot.lane.b32.xlu0 %v1381_v25, %s1572_s25 }
0x1130   : > { %v1383_v27 = vpop.eup %1382 }
0x1131   : > { %v988_v28 = vadd.f32 1.0, %v1383_v27 }
0x1133   : > { %v989_v29 = vmul.f32 0.5, %v988_v28 }
0x1135   : > { %v996_v33 = vmul.f32 %v994_v32, %v989_v29 }
0x11a1   : > { %v999_v30 = vpop.permute.xlu0 %998 }
0x11a2   : > { %v1001_v31 = vmul.f32 %v999_v30, %v989_v29 }
0x11a4   : > { %1003 = vrot.lane.b32.xlu2 %v1001_v31, %s1573_s30 }
0x11fe   : > { %v1004_v34 = vpop.permute.xlu2 %1003 }
0x11ff   : > { %v1006_v8 = vadd.f32 %v1004_v34, %v996_v33 }
0x1201   : > { %1384 = vtanh.f32 %v1006_v8  ;;  %1015 = vrot.lane.b32.xlu2 %v1006_v8, %s1574_s22 }
0x1207   : > { %v1385_v3 = vpop.eup %1384 }
0x1208   : > { %1009 = vrot.lane.b32.xlu0 %v1385_v3, %s1572_s25 }
0x125b   : > { %v1016_v35 = vpop.permute.xlu2 %1015 }
0x125c   : > { %1018 = vst.msk [vmem:[#allocation3] sm:$0x3] %vm449_vm6, %v1016_v35 }
0x127a   : > { %v1010_v36 = vpop.permute.xlu0 %1009 }
0x127b   : > { %v1012_v37 = vmul.f32 %v1010_v36, %v989_v29 }
0x127d   : > { %v1013_v38 = vpack.c.bf16 %v1012_v37, %v1012_v37 }
0x127f   : > { %v1020_v39 = vrot.slane %v1013_v38, 3 }
0x1281   : > { %v1023_v40 = vsel %vm453_vm4, %v1013_v38, %v1020_v39 }
0x1282   : > { %1025 = vrot.lane.b32.xlu1 %v1023_v40, %s1573_s30 }
0x12f4   : > { %v1026_v41 = vpop.permute.xlu1 %1025 }
0x12f5   : > { %1028 = vst.msk [vmem:[#allocation2] sm:$0x1] %vm461_vm5, %v1026_v41 }
0x12f6   : > { %1235 = vst.msk [vmem:[%s1720_s1 + $0x7] sm:$0x1] %vm461_vm5, %v1026_v41 }
0x12f7   : > { %1503 = shalt.err (!%p1500_p3)
}
0x12f8   : > { %s1575_s21 = smov 16   ;;  %s1576_s1 = smov 1  }
0x12f9   : > { %1253 = dma.vmem_to_hbm [thread:$0]  (%p1685_p7), %s1052_s11, 128, %s1054_s12, %s1032_s13, %s1575_s21, %s1575_s21, %s1576_s1  }
0x12fa PF: > { %s1068_s25 = sand.u32 1, %s1542_s15   ;;  %p1267_p5 = pnand %p1185_p11, %p1651_p6 }
0x12fb   : > { %s1069_s30 = scalar_lea.sflag [#allocation6], %s1068_s25 }
0x12fc   : > { %p1268_p9 = pneg %p1267_p5 }
0x12fe   : > { %1537 = dma.done.wait (%p1268_p9), %s1069_s30, 128  }
0x12ff   : > { %1539 = vsyncadd (%p1268_p9), %s1069_s30, 4294967168  ;;  %s21_s20 = sadd.s32 1, %s1562_s20   ;;  %s1933_s15 = smov %s1546_s16 }
0x1300   : > { %p18_p2 = scmp.ge.s32.totalorder %s21_s20, 4   ;;  %s1934_s16 = smov %s1550_s17 }
0x1301   : > { %s1935_s17 = smov %s1694_s7  ;;  %s1936_s18 = smov %s1558_s19 }
0x1302   : > { %s1937_s19 = smov %s1939_s14  ;;  %20 = sbr.rel (!%p18_p2) target bundleno = 10 (0xa), region = 112 }
0x1307   :  { %1075 = vsyncpa [#allocation5], 1 }
0x1308   :  { %1077 = vsyncpa [#allocation5 + $0x1], 1 }
0x1309   :  { %1078 = vsyncpa [#allocation8], 1 }
0x130a   :  { %1079 = vsyncpa [#allocation6], 1 }
0x130b   :  { %1081 = vsyncpa [#allocation6 + $0x1], 1 }

</bundles_post_ra>
